<compile_context>
chip_gen: v7x
topology: tpu7x:2x2x1
jax: 0.10.0
libtpu: 0.0.40
codegen_flags: <defaults>
</compile_context>

<pallas_src>
import functools

import jax
import jax.numpy as jnp
from jax import lax
from jax.experimental import pallas as pl
from jax.experimental.pallas import tpu as pltpu

EPS = 1e-5
LANE = 128   # output-channel padding -> lane-dense stores
SUB = 8      # sublane multiple


# ---------------------------------------------------------------------------
# small helpers
# ---------------------------------------------------------------------------
def _ceil_to(x, m):
    return (x + m - 1) // m * m


def _pad_to(a, axis, size):
    if a.shape[axis] >= size:
        return a
    pads = [(0, 0)] * a.ndim
    pads[axis] = (0, size - a.shape[axis])
    return jnp.pad(a, pads)


# ---------------------------------------------------------------------------
# Pallas kernel: fused 3x3 conv (in-kernel im2col) + folded BN + skip + ReLU
# ---------------------------------------------------------------------------
def _fused_conv_kernel(*refs, stride, w_phase, tile_rows, n_row_tiles,
                       relu, skip_mode):
    """refs (in order):
      x_ref   (1, stride*stride, L, Ci)   flattened zero-padded phase planes (f32)
      w_ref   (9, Ci, Co)                 BN-scale-folded conv weights (bf16)
      sh_ref  (1, Co)                     BN shift (f32)
      [xs_ref (1, M, Cs), ws_ref (Cs, Co), shs_ref (1, Co)]  if skip == "conv"
      [id_ref (1, M, Co)]                                    if skip == "identity"
      o_ref   (1, M, Co)                  M = tile_rows * w_phase
    """
    if skip_mode == "conv":
        x_ref, w_ref, sh_ref, xs_ref, ws_ref, shs_ref, o_ref = refs
    elif skip_mode == "identity":
        x_ref, w_ref, sh_ref, id_ref, o_ref = refs
    else:
        x_ref, w_ref, sh_ref, o_ref = refs

    m = tile_rows * w_phase
    if n_row_tiles == 1:
        base = 0                                      # fully static slicing
    else:
        base = pl.multiple_of(pl.program_id(1) * m, 8)

    mxu_dtype = w_ref.dtype
    acc = None
    for kh in range(3):                               # 9 accumulating MXU matmuls
        for kw in range(3):
            phase = (kh % stride) * stride + (kw % stride)
            start = base + (kh // stride) * w_phase + (kw // stride)
            xt = x_ref[0, phase, pl.ds(start, m), :].astype(mxu_dtype)
            part = jnp.dot(xt, w_ref[kh * 3 + kw],
                           preferred_element_type=jnp.float32)
            acc = part if acc is None else acc + part

    acc = acc + sh_ref[...]                           # folded-BN shift (f32)
    if skip_mode == "conv":                           # fused 1x1-conv + BN skip
        acc = acc + jnp.dot(xs_ref[0], ws_ref[...],
                            preferred_element_type=jnp.float32) + shs_ref[...]
    elif skip_mode == "identity":                     # fused identity skip
        acc = acc + id_ref[0].astype(jnp.float32)
    if relu:
        acc = jnp.maximum(acc, 0.0)
    o_ref[0] = acc.astype(o_ref.dtype)


# ---------------------------------------------------------------------------
# wrapper-side layout glue (plain JAX, ~1x activation traffic)
# ---------------------------------------------------------------------------
def _phase_flatten(x, stride, ho_pad, w_phase):
    """x: (N, H, W, C) activation (spatially unpadded, channels padded).

    Builds the stride-phase decomposition of the zero-padded (pad=1) input and
    flattens each phase plane so that conv tap (kh, kw) of the output block
    rows [r0, r0+TR) x [0, w_phase) is the contiguous window
        [(r0 + kh//stride)*w_phase + kw//stride,  ... + TR*w_phase)
    of phase ((kh % stride), (kw % stride)).
    Returns (N, stride*stride, L, C)."""
    N, H, W, C = x.shape
    xp = jnp.pad(x, ((0, 0), (1, 1), (1, 1), (0, 0)))
    hp, wp = H + 2, W + 2
    h0 = -(-hp // stride)
    w0 = -(-wp // stride)
    xp = _pad_to(xp, 1, h0 * stride)
    xp = _pad_to(xp, 2, w0 * stride)
    ph = xp.reshape(N, h0, stride, w0, stride, C).transpose(0, 2, 4, 1, 3, 5)
    hph = max(h0, ho_pad + 2 // stride + 1)           # +1 slack row: never OOB
    ph = _pad_to(ph, 3, hph)
    ph = _pad_to(ph, 4, w_phase)
    return ph.reshape(N, stride * stride, ph.shape[3] * ph.shape[4], C)


def _flat_out_layout(a, ho_pad, w_phase, c_pad):
    """(N, Ho, Wo, C) -> (N, ho_pad*w_phase, c_pad): kernel's flattened output
    geometry (used for the fused residual / skip-conv operands)."""
    a = _pad_to(a, 1, ho_pad)
    a = _pad_to(a, 2, w_phase)
    a = _pad_to(a, 3, c_pad)
    return a.reshape(a.shape[0], ho_pad * w_phase, c_pad)


def _prep_conv_w(w_oihw, scale, ci_pad, co_pad, dtype):
    """(Co, Ci, 3, 3) OIHW + BN scale -> (9, ci_pad, co_pad), scale folded."""
    co, ci = w_oihw.shape[:2]
    w = jnp.transpose(w_oihw, (2, 3, 1, 0)) * scale[None, None, None, :]
    w = w.reshape(9, ci, co)
    return jnp.pad(w, ((0, 0), (0, ci_pad - ci), (0, co_pad - co))).astype(dtype)


def _prep_skip_w(w_oihw, scale, ci_pad, co_pad, dtype):
    """(Co, Ci, 1, 1) OIHW + BN scale -> (ci_pad, co_pad), scale folded."""
    co, ci = w_oihw.shape[:2]
    w = w_oihw[:, :, 0, 0].T * scale[None, :]
    return jnp.pad(w, ((0, ci_pad - ci), (0, co_pad - co))).astype(dtype)


def _prep_shift(shift, co_pad):
    co = shift.shape[0]
    return jnp.pad(shift, (0, co_pad - co)).reshape(1, co_pad).astype(jnp.float32)


def fold_bn(gamma, beta, mean, var):
    scale = gamma / jnp.sqrt(var + EPS)
    return scale, beta - mean * scale


# ---------------------------------------------------------------------------
# one fused conv3x3(+pad=1) + BN (+ fused skip) + ReLU  ->  one pallas_call
# ---------------------------------------------------------------------------
def fused_conv3x3_bn(x, w_oihw, scale, shift, *, stride=1, relu=True,
                     skip=None, compute_dtype=jnp.bfloat16, target_m=512):
    """x: (N, H, W, Ci) f32 NHWC; w_oihw: (Co, Ci, 3, 3).
    skip: None | ("identity", arr (N, Ho, Wo, Co))
               | ("conv", xs (N, Ho, Wo, Cs), ws (Co, Cs, 1, 1), scale_s, shift_s)
    Returns (N, Ho, Wo, Co) f32."""
    N, H, W, Ci = x.shape
    Co = w_oihw.shape[0]
    Ho = (H - 1) // stride + 1
    Wo = (W - 1) // stride + 1
    ci_pad = _ceil_to(Ci, SUB)       # K padded to a sublane multiple
    co_pad = _ceil_to(Co, LANE)      # lane-dense output channels

    # output geometry: flattened (rows x phase-width) slab; rows tiled by grid
    w_phase = _ceil_to(-(-(W + 2) // stride), SUB)
    tile_rows = max(1, min(Ho, target_m // w_phase))
    ho_pad = _ceil_to(Ho, tile_rows)
    n_row_tiles = ho_pad // tile_rows
    m_tile = tile_rows * w_phase

    # operand prep (no im2col blowup: ~1x activation traffic)
    xc = _pad_to(x, 3, ci_pad)                                   # f32 phases
    phases = _phase_flatten(xc, stride, ho_pad, w_phase)
    wk = _prep_conv_w(w_oihw, scale, ci_pad, co_pad, compute_dtype)
    sh = _prep_shift(shift, co_pad)
    L = phases.shape[2]

    in_specs = [
        pl.BlockSpec((1, stride * stride, L, ci_pad), lambda n, t: (n, 0, 0, 0)),
        pl.BlockSpec((9, ci_pad, co_pad), lambda n, t: (0, 0, 0)),
        pl.BlockSpec((1, co_pad), lambda n, t: (0, 0)),
    ]
    args = [phases, wk, sh]

    skip_mode = None if skip is None else skip[0]
    if skip_mode == "conv":
        _, xs, ws, scale_s, shift_s = skip
        cs_pad = _ceil_to(xs.shape[-1], SUB)
        args += [
            _flat_out_layout(xs, ho_pad, w_phase, cs_pad).astype(compute_dtype),
            _prep_skip_w(ws, scale_s, cs_pad, co_pad, compute_dtype),
            _prep_shift(shift_s, co_pad),
        ]
        in_specs += [
            pl.BlockSpec((1, m_tile, cs_pad), lambda n, t: (n, t, 0)),
            pl.BlockSpec((cs_pad, co_pad), lambda n, t: (0, 0)),
            pl.BlockSpec((1, co_pad), lambda n, t: (0, 0)),
        ]
    elif skip_mode == "identity":
        args.append(_flat_out_layout(skip[1], ho_pad, w_phase,
                                     co_pad).astype(compute_dtype))
        in_specs.append(pl.BlockSpec((1, m_tile, co_pad), lambda n, t: (n, t, 0)))

    kernel = functools.partial(
        _fused_conv_kernel, stride=stride, w_phase=w_phase,
        tile_rows=tile_rows, n_row_tiles=n_row_tiles, relu=relu,
        skip_mode=skip_mode)

    flops = 2 * N * ho_pad * w_phase * co_pad * ci_pad * (9 + (skip_mode == "conv"))
    bytes_accessed = int(sum(a.size * a.dtype.itemsize for a in args)
                         + N * ho_pad * w_phase * co_pad * 4)

    out = pl.pallas_call(
        kernel,
        out_shape=jax.ShapeDtypeStruct((N, ho_pad * w_phase, co_pad), jnp.float32),
        grid=(N, n_row_tiles),
        in_specs=in_specs,
        out_specs=pl.BlockSpec((1, m_tile, co_pad), lambda n, t: (n, t, 0)),
        compiler_params=pltpu.CompilerParams(
            dimension_semantics=("parallel", "arbitrary")),
        cost_estimate=pl.CostEstimate(flops=flops, transcendentals=0,
                                      bytes_accessed=bytes_accessed),
    )(*args)

    out = out.reshape(N, ho_pad, w_phase, co_pad)
    return out[:, :Ho, :Wo, :Co]


# ---------------------------------------------------------------------------
# ResidualBlock forward (NCHW in / NCHW out) — exactly two fused Pallas calls
# ---------------------------------------------------------------------------
def residual_block(x_nchw, params, stride):
    x = jnp.transpose(x_nchw, (0, 2, 3, 1)).astype(jnp.float32)   # NHWC
    Ci = x.shape[-1]
    Co = params["w1"].shape[0]
    has_skip = (stride != 1) or (Ci != Co)

    s1, b1 = fold_bn(params["g1"], params["b1"], params["m1"], params["v1"])
    s2, b2 = fold_bn(params["g2"], params["b2"], params["m2"], params["v2"])

    # conv1 -> bn1 -> relu (fused; stride handled via phase planes)
    out1 = fused_conv3x3_bn(x, params["w1"], s1, b1, stride=stride, relu=True)
    ho, wo = out1.shape[1], out1.shape[2]

    if has_skip:
        ss, bs = fold_bn(params["gs"], params["bs"], params["ms"], params["vs"])
        xs = x[:, ::stride, ::stride, :][:, :ho, :wo, :]
        skip = ("conv", xs, params["ws"], ss, bs)
    else:
        skip = ("identity", x)

    # conv2 -> bn2 -> (+ fused skip) -> relu (single fused kernel)
    out = fused_conv3x3_bn(out1, params["w2"], s2, b2, stride=1, relu=True,
                           skip=skip)
    return jnp.transpose(out, (0, 3, 1, 2))                       # back to NCHW


# ---------------------------------------------------------------------------
# parameter init + references
# ---------------------------------------------------------------------------
def init_params(key, cin, cout, stride):
    ks = jax.random.split(key, 16)

    def bn_params(i):
        return (1.0 + 0.1 * jax.random.normal(ks[i], (cout,), jnp.float32),
                0.1 * jax.random.normal(ks[i + 1], (cout,), jnp.float32),
                0.05 * jax.random.normal(ks[i + 2], (cout,), jnp.float32),
                0.5 + 0.5 * jnp.abs(jax.random.normal(ks[i + 3], (cout,),
                                                      jnp.float32)))
    p = {}
    p["w1"] = 0.1 * jax.random.normal(ks[0], (cout, cin, 3, 3), jnp.float32)
    p["g1"], p["b1"], p["m1"], p["v1"] = bn_params(1)
    p["w2"] = 0.1 * jax.random.normal(ks[5], (cout, cout, 3, 3), jnp.float32)
    p["g2"], p["b2"], p["m2"], p["v2"] = bn_params(6)
    if stride != 1 or cin != cout:
        p["ws"] = 0.1 * jax.random.normal(ks[10], (cout, cin, 1, 1), jnp.float32)
        p["gs"], p["bs"], p["ms"], p["vs"] = bn_params(11)
    return p


def ref_block(x_nchw, params, stride):
    """Pure-f32 reference with PyTorch (eval-mode BN) semantics."""
    x = jnp.transpose(x_nchw, (0, 2, 3, 1)).astype(jnp.float32)

    def conv(inp, w_oihw, s, pad):
        w = jnp.transpose(w_oihw, (2, 3, 1, 0))
        return lax.conv_general_dilated(
            inp, w, (s, s), [(pad, pad), (pad, pad)],
            dimension_numbers=("NHWC", "HWIO", "NHWC"))

    def bn(inp, g, b, m, v):
        return (inp - m) * (g / jnp.sqrt(v + EPS)) + b

    ci, co = x.shape[-1], params["w1"].shape[0]
    if stride != 1 or ci != co:
        identity = bn(conv(x, params["ws"], stride, 0),
                      params["gs"], params["bs"], params["ms"], params["vs"])
    else:
        identity = x
    out = jax.nn.relu(bn(conv(x, params["w1"], stride, 1),
                         params["g1"], params["b1"], params["m1"], params["v1"]))
    out = bn(conv(out, params["w2"], 1, 1),
             params["g2"], params["b2"], params["m2"], params["v2"])
    out = jax.nn.relu(out + identity)
    return jnp.transpose(out, (0, 3, 1, 2))


def ref_block_bf16(x_nchw, params, stride, dtype=jnp.bfloat16):
    """Reference matching the kernel's numerics: BN scale folded into bf16
    weights, bf16 activations, f32 accumulation."""
    x = jnp.transpose(x_nchw, (0, 2, 3, 1)).astype(jnp.float32)

    def conv(inp, w_oihw, scale, s, pad):
        wf = (jnp.transpose(w_oihw, (2, 3, 1, 0)) * scale).astype(dtype)
        return lax.conv_general_dilated(
            inp.astype(dtype), wf, (s, s), [(pad, pad), (pad, pad)],
            dimension_numbers=("NHWC", "HWIO", "NHWC"),
            preferred_element_type=jnp.float32)

    ci, co = x.shape[-1], params["w1"].shape[0]
    s1, b1 = fold_bn(params["g1"], params["b1"], params["m1"], params["v1"])
    s2, b2 = fold_bn(params["g2"], params["b2"], params["m2"], params["v2"])
    if stride != 1 or ci != co:
        ss, bs = fold_bn(params["gs"], params["bs"], params["ms"], params["vs"])
        identity = conv(x, params["ws"], ss, stride, 0) + bs
    else:
        identity = x.astype(dtype).astype(jnp.float32)
    out1 = jax.nn.relu(conv(x, params["w1"], s1, stride, 1) + b1)
    out = conv(out1, params["w2"], s2, 1, 1) + b2
    out = jax.nn.relu(out + identity)
    return jnp.transpose(out, (0, 3, 1, 2))


# ---------------------------------------------------------------------------
if __name__ == "__main__":
    key = jax.random.PRNGKey(0)
    k_x1, k_p1, k_x2, k_p2 = jax.random.split(key, 4)

    run = jax.jit(residual_block, static_argnums=2)

    # Case 1: downsampling block with fused 1x1-conv skip (stride=2, cin != cout)
    x1 = jax.random.normal(k_x1, (2, 4, 16, 16), jnp.float32)
    p1 = init_params(k_p1, cin=4, cout=8, stride=2)
    out1 = jax.block_until_ready(run(x1, p1, 2))
    assert out1.shape == (2, 8, 8, 8), out1.shape
    ref1_bf = ref_block_bf16(x1, p1, 2)
    ref1_fp = ref_block(x1, p1, 2)
    assert jnp.allclose(out1, ref1_bf, atol=2e-3, rtol=2e-3), \
        float(jnp.max(jnp.abs(out1 - ref1_bf)))
    assert jnp.allclose(out1, ref1_fp, atol=1e-1, rtol=1e-1), \
        float(jnp.max(jnp.abs(out1 - ref1_fp)))

    # Case 2: identity-skip block (stride=1, cin == cout)
    x2 = jax.random.normal(k_x2, (2, 8, 16, 16), jnp.float32)
    p2 = init_params(k_p2, cin=8, cout=8, stride=1)
    out2 = jax.block_until_ready(run(x2, p2, 1))
    assert out2.shape == (2, 8, 16, 16), out2.shape
    ref2_bf = ref_block_bf16(x2, p2, 1)
    ref2_fp = ref_block(x2, p2, 1)
    assert jnp.allclose(out2, ref2_bf, atol=2e-3, rtol=2e-3), \
        float(jnp.max(jnp.abs(out2 - ref2_bf)))
    assert jnp.allclose(out2, ref2_fp, atol=1e-1, rtol=1e-1), \
        float(jnp.max(jnp.abs(out2 - ref2_fp)))

    print("KERNEL_OK")
</pallas_src>

<mosaic_0001>
module attributes {stable_mosaic.version = 11 : i64} {
  func.func @_fused_conv_kernel(%arg0: i32, %arg1: i32, %arg2: memref<1x4x160x8xf32, #tpu.memory_space<vmem>>, %arg3: memref<9x8x128xbf16, #tpu.memory_space<vmem>>, %arg4: memref<1x128xf32, #tpu.memory_space<vmem>>, %arg5: memref<1x128x128xf32, #tpu.memory_space<vmem>>) attributes {dimension_semantics = [#tpu.dimension_semantics<parallel>, #tpu.dimension_semantics<arbitrary>], iteration_bounds = array<i64: 2, 1>, scalar_prefetch = 0 : i64, scratch_operands = 0 : i64, tpu.core_type = #tpu.core_type<tc>, window_params = [{transform_indices = @transform_0, window_bounds = array<i64: 1, 4, 160, 8>}, {pipeline_mode = #tpu.pipeline_mode<synchronous>, transform_indices = @transform_1, window_bounds = array<i64: 9, 8, 128>}, {pipeline_mode = #tpu.pipeline_mode<synchronous>, transform_indices = @transform_2, window_bounds = array<i64: 1, 128>}, {transform_indices = @transform_3, window_bounds = array<i64: 1, 128, 128>}]} {
    %c0 = arith.constant 0 : index
    %c0_0 = arith.constant 0 : index
    %c0_1 = arith.constant 0 : index
    %c0_2 = arith.constant 0 : index
    %0 = vector.load %arg2[%c0, %c0_0, %c0_1, %c0_2] : memref<1x4x160x8xf32, #tpu.memory_space<vmem>>, vector<1x1x128x8xf32>
    %1 = vector.shape_cast %0 : vector<1x1x128x8xf32> to vector<128x8xf32>
    %2 = arith.truncf %1 : vector<128x8xf32> to vector<128x8xbf16>
    %c0_3 = arith.constant 0 : index
    %c0_4 = arith.constant 0 : index
    %c0_5 = arith.constant 0 : index
    %3 = vector.load %arg3[%c0_3, %c0_4, %c0_5] : memref<9x8x128xbf16, #tpu.memory_space<vmem>>, vector<1x8x128xbf16>
    %4 = vector.shape_cast %3 : vector<1x8x128xbf16> to vector<8x128xbf16>
    %cst = arith.constant dense<0.000000e+00> : vector<128x128xf32>
    %5 = tpu.matmul %2, %4, %cst {dimension_numbers = #tpu.dot_dimension_numbers<[1], [0], [0], [1], [0, 0, 1, 1], [], []>} : vector<128x8xbf16>, vector<8x128xbf16>, vector<128x128xf32> -> vector<128x128xf32>
    %c0_6 = arith.constant 0 : index
    %c1 = arith.constant 1 : index
    %c0_7 = arith.constant 0 : index
    %c0_8 = arith.constant 0 : index
    %6 = vector.load %arg2[%c0_6, %c1, %c0_7, %c0_8] : memref<1x4x160x8xf32, #tpu.memory_space<vmem>>, vector<1x1x128x8xf32>
    %7 = vector.shape_cast %6 : vector<1x1x128x8xf32> to vector<128x8xf32>
    %8 = arith.truncf %7 : vector<128x8xf32> to vector<128x8xbf16>
    %c1_9 = arith.constant 1 : index
    %c0_10 = arith.constant 0 : index
    %c0_11 = arith.constant 0 : index
    %9 = vector.load %arg3[%c1_9, %c0_10, %c0_11] : memref<9x8x128xbf16, #tpu.memory_space<vmem>>, vector<1x8x128xbf16>
    %10 = vector.shape_cast %9 : vector<1x8x128xbf16> to vector<8x128xbf16>
    %cst_12 = arith.constant dense<0.000000e+00> : vector<128x128xf32>
    %11 = tpu.matmul %8, %10, %cst_12 {dimension_numbers = #tpu.dot_dimension_numbers<[1], [0], [0], [1], [0, 0, 1, 1], [], []>} : vector<128x8xbf16>, vector<8x128xbf16>, vector<128x128xf32> -> vector<128x128xf32>
    %12 = arith.addf %5, %11 : vector<128x128xf32>
    %c0_13 = arith.constant 0 : index
    %c0_14 = arith.constant 0 : index
    %c1_15 = arith.constant 1 : index
    %c0_16 = arith.constant 0 : index
    %13 = vector.load %arg2[%c0_13, %c0_14, %c1_15, %c0_16] : memref<1x4x160x8xf32, #tpu.memory_space<vmem>>, vector<1x1x128x8xf32>
    %14 = vector.shape_cast %13 : vector<1x1x128x8xf32> to vector<128x8xf32>
    %15 = arith.truncf %14 : vector<128x8xf32> to vector<128x8xbf16>
    %c2 = arith.constant 2 : index
    %c0_17 = arith.constant 0 : index
    %c0_18 = arith.constant 0 : index
    %16 = vector.load %arg3[%c2, %c0_17, %c0_18] : memref<9x8x128xbf16, #tpu.memory_space<vmem>>, vector<1x8x128xbf16>
    %17 = vector.shape_cast %16 : vector<1x8x128xbf16> to vector<8x128xbf16>
    %cst_19 = arith.constant dense<0.000000e+00> : vector<128x128xf32>
    %18 = tpu.matmul %15, %17, %cst_19 {dimension_numbers = #tpu.dot_dimension_numbers<[1], [0], [0], [1], [0, 0, 1, 1], [], []>} : vector<128x8xbf16>, vector<8x128xbf16>, vector<128x128xf32> -> vector<128x128xf32>
    %19 = arith.addf %12, %18 : vector<128x128xf32>
    %c0_20 = arith.constant 0 : index
    %c2_21 = arith.constant 2 : index
    %c0_22 = arith.constant 0 : index
    %c0_23 = arith.constant 0 : index
    %20 = vector.load %arg2[%c0_20, %c2_21, %c0_22, %c0_23] : memref<1x4x160x8xf32, #tpu.memory_space<vmem>>, vector<1x1x128x8xf32>
    %21 = vector.shape_cast %20 : vector<1x1x128x8xf32> to vector<128x8xf32>
    %22 = arith.truncf %21 : vector<128x8xf32> to vector<128x8xbf16>
    %c3 = arith.constant 3 : index
    %c0_24 = arith.constant 0 : index
    %c0_25 = arith.constant 0 : index
    %23 = vector.load %arg3[%c3, %c0_24, %c0_25] : memref<9x8x128xbf16, #tpu.memory_space<vmem>>, vector<1x8x128xbf16>
    %24 = vector.shape_cast %23 : vector<1x8x128xbf16> to vector<8x128xbf16>
    %cst_26 = arith.constant dense<0.000000e+00> : vector<128x128xf32>
    %25 = tpu.matmul %22, %24, %cst_26 {dimension_numbers = #tpu.dot_dimension_numbers<[1], [0], [0], [1], [0, 0, 1, 1], [], []>} : vector<128x8xbf16>, vector<8x128xbf16>, vector<128x128xf32> -> vector<128x128xf32>
    %26 = arith.addf %19, %25 : vector<128x128xf32>
    %c0_27 = arith.constant 0 : index
    %c3_28 = arith.constant 3 : index
    %c0_29 = arith.constant 0 : index
    %c0_30 = arith.constant 0 : index
    %27 = vector.load %arg2[%c0_27, %c3_28, %c0_29, %c0_30] : memref<1x4x160x8xf32, #tpu.memory_space<vmem>>, vector<1x1x128x8xf32>
    %28 = vector.shape_cast %27 : vector<1x1x128x8xf32> to vector<128x8xf32>
    %29 = arith.truncf %28 : vector<128x8xf32> to vector<128x8xbf16>
    %c4 = arith.constant 4 : index
    %c0_31 = arith.constant 0 : index
    %c0_32 = arith.constant 0 : index
    %30 = vector.load %arg3[%c4, %c0_31, %c0_32] : memref<9x8x128xbf16, #tpu.memory_space<vmem>>, vector<1x8x128xbf16>
    %31 = vector.shape_cast %30 : vector<1x8x128xbf16> to vector<8x128xbf16>
    %cst_33 = arith.constant dense<0.000000e+00> : vector<128x128xf32>
    %32 = tpu.matmul %29, %31, %cst_33 {dimension_numbers = #tpu.dot_dimension_numbers<[1], [0], [0], [1], [0, 0, 1, 1], [], []>} : vector<128x8xbf16>, vector<8x128xbf16>, vector<128x128xf32> -> vector<128x128xf32>
    %33 = arith.addf %26, %32 : vector<128x128xf32>
    %c0_34 = arith.constant 0 : index
    %c2_35 = arith.constant 2 : index
    %c1_36 = arith.constant 1 : index
    %c0_37 = arith.constant 0 : index
    %34 = vector.load %arg2[%c0_34, %c2_35, %c1_36, %c0_37] : memref<1x4x160x8xf32, #tpu.memory_space<vmem>>, vector<1x1x128x8xf32>
    %35 = vector.shape_cast %34 : vector<1x1x128x8xf32> to vector<128x8xf32>
    %36 = arith.truncf %35 : vector<128x8xf32> to vector<128x8xbf16>
    %c5 = arith.constant 5 : index
    %c0_38 = arith.constant 0 : index
    %c0_39 = arith.constant 0 : index
    %37 = vector.load %arg3[%c5, %c0_38, %c0_39] : memref<9x8x128xbf16, #tpu.memory_space<vmem>>, vector<1x8x128xbf16>
    %38 = vector.shape_cast %37 : vector<1x8x128xbf16> to vector<8x128xbf16>
    %cst_40 = arith.constant dense<0.000000e+00> : vector<128x128xf32>
    %39 = tpu.matmul %36, %38, %cst_40 {dimension_numbers = #tpu.dot_dimension_numbers<[1], [0], [0], [1], [0, 0, 1, 1], [], []>} : vector<128x8xbf16>, vector<8x128xbf16>, vector<128x128xf32> -> vector<128x128xf32>
    %40 = arith.addf %33, %39 : vector<128x128xf32>
    %c0_41 = arith.constant 0 : index
    %c0_42 = arith.constant 0 : index
    %c16 = arith.constant 16 : index
    %c0_43 = arith.constant 0 : index
    %41 = vector.load %arg2[%c0_41, %c0_42, %c16, %c0_43] : memref<1x4x160x8xf32, #tpu.memory_space<vmem>>, vector<1x1x128x8xf32>
    %42 = vector.shape_cast %41 : vector<1x1x128x8xf32> to vector<128x8xf32>
    %43 = arith.truncf %42 : vector<128x8xf32> to vector<128x8xbf16>
    %c6 = arith.constant 6 : index
    %c0_44 = arith.constant 0 : index
    %c0_45 = arith.constant 0 : index
    %44 = vector.load %arg3[%c6, %c0_44, %c0_45] : memref<9x8x128xbf16, #tpu.memory_space<vmem>>, vector<1x8x128xbf16>
    %45 = vector.shape_cast %44 : vector<1x8x128xbf16> to vector<8x128xbf16>
    %cst_46 = arith.constant dense<0.000000e+00> : vector<128x128xf32>
    %46 = tpu.matmul %43, %45, %cst_46 {dimension_numbers = #tpu.dot_dimension_numbers<[1], [0], [0], [1], [0, 0, 1, 1], [], []>} : vector<128x8xbf16>, vector<8x128xbf16>, vector<128x128xf32> -> vector<128x128xf32>
    %47 = arith.addf %40, %46 : vector<128x128xf32>
    %c0_47 = arith.constant 0 : index
    %c1_48 = arith.constant 1 : index
    %c16_49 = arith.constant 16 : index
    %c0_50 = arith.constant 0 : index
    %48 = vector.load %arg2[%c0_47, %c1_48, %c16_49, %c0_50] : memref<1x4x160x8xf32, #tpu.memory_space<vmem>>, vector<1x1x128x8xf32>
    %49 = vector.shape_cast %48 : vector<1x1x128x8xf32> to vector<128x8xf32>
    %50 = arith.truncf %49 : vector<128x8xf32> to vector<128x8xbf16>
    %c7 = arith.constant 7 : index
    %c0_51 = arith.constant 0 : index
    %c0_52 = arith.constant 0 : index
    %51 = vector.load %arg3[%c7, %c0_51, %c0_52] : memref<9x8x128xbf16, #tpu.memory_space<vmem>>, vector<1x8x128xbf16>
    %52 = vector.shape_cast %51 : vector<1x8x128xbf16> to vector<8x128xbf16>
    %cst_53 = arith.constant dense<0.000000e+00> : vector<128x128xf32>
    %53 = tpu.matmul %50, %52, %cst_53 {dimension_numbers = #tpu.dot_dimension_numbers<[1], [0], [0], [1], [0, 0, 1, 1], [], []>} : vector<128x8xbf16>, vector<8x128xbf16>, vector<128x128xf32> -> vector<128x128xf32>
    %54 = arith.addf %47, %53 : vector<128x128xf32>
    %c0_54 = arith.constant 0 : index
    %c0_55 = arith.constant 0 : index
    %c17 = arith.constant 17 : index
    %c0_56 = arith.constant 0 : index
    %55 = vector.load %arg2[%c0_54, %c0_55, %c17, %c0_56] : memref<1x4x160x8xf32, #tpu.memory_space<vmem>>, vector<1x1x128x8xf32>
    %56 = vector.shape_cast %55 : vector<1x1x128x8xf32> to vector<128x8xf32>
    %57 = arith.truncf %56 : vector<128x8xf32> to vector<128x8xbf16>
    %c8 = arith.constant 8 : index
    %c0_57 = arith.constant 0 : index
    %c0_58 = arith.constant 0 : index
    %58 = vector.load %arg3[%c8, %c0_57, %c0_58] : memref<9x8x128xbf16, #tpu.memory_space<vmem>>, vector<1x8x128xbf16>
    %59 = vector.shape_cast %58 : vector<1x8x128xbf16> to vector<8x128xbf16>
    %cst_59 = arith.constant dense<0.000000e+00> : vector<128x128xf32>
    %60 = tpu.matmul %57, %59, %cst_59 {dimension_numbers = #tpu.dot_dimension_numbers<[1], [0], [0], [1], [0, 0, 1, 1], [], []>} : vector<128x8xbf16>, vector<8x128xbf16>, vector<128x128xf32> -> vector<128x128xf32>
    %61 = arith.addf %54, %60 : vector<128x128xf32>
    %c0_60 = arith.constant 0 : index
    %c0_61 = arith.constant 0 : index
    %62 = vector.load %arg4[%c0_60, %c0_61] : memref<1x128xf32, #tpu.memory_space<vmem>>, vector<1x128xf32>
    %63 = vector.broadcast %62 : vector<1x128xf32> to vector<128x128xf32>
    %64 = arith.addf %61, %63 : vector<128x128xf32>
    %cst_62 = arith.constant 0.000000e+00 : f32
    %65 = vector.broadcast %cst_62 : f32 to vector<128x128xf32>
    %66 = arith.maximumf %64, %65 : vector<128x128xf32>
    %c0_63 = arith.constant 0 : index
    %c0_64 = arith.constant 0 : index
    %c0_65 = arith.constant 0 : index
    %67 = vector.load %arg5[%c0_63, %c0_64, %c0_65] : memref<1x128x128xf32, #tpu.memory_space<vmem>>, vector<1x128x128xf32>
    %68 = vector.shape_cast %67 : vector<1x128x128xf32> to vector<128x128xf32>
    %69 = vector.shape_cast %66 : vector<128x128xf32> to vector<1x128x128xf32>
    tpu.vector_store %arg5[%c0_63, %c0_64, %c0_65], %69 {strides = array<i32>} : memref<1x128x128xf32, #tpu.memory_space<vmem>>, vector<1x128x128xf32>,
    return
  }
  func.func @transform_0(%arg0: i32, %arg1: i32) -> (i32, i32, i32, i32) {
    %c0_i32 = arith.constant 0 : i32
    %c0_i32_0 = arith.constant 0 : i32
    %c0_i32_1 = arith.constant 0 : i32
    %c0_i32_2 = arith.constant 0 : i32
    return %arg0, %c0_i32, %c0_i32_0, %c0_i32_1 : i32, i32, i32, i32
  }
  func.func @transform_1(%arg0: i32, %arg1: i32) -> (i32, i32, i32) {
    %c0_i32 = arith.constant 0 : i32
    %c0_i32_0 = arith.constant 0 : i32
    %c0_i32_1 = arith.constant 0 : i32
    %c0_i32_2 = arith.constant 0 : i32
    return %c0_i32, %c0_i32_0, %c0_i32_1 : i32, i32, i32
  }
  func.func @transform_2(%arg0: i32, %arg1: i32) -> (i32, i32) {
    %c0_i32 = arith.constant 0 : i32
    %c0_i32_0 = arith.constant 0 : i32
    %c0_i32_1 = arith.constant 0 : i32
    return %c0_i32, %c0_i32_0 : i32, i32
  }
  func.func @transform_3(%arg0: i32, %arg1: i32) -> (i32, i32, i32) {
    %c0_i32 = arith.constant 0 : i32
    %c0_i32_0 = arith.constant 0 : i32
    return %arg0, %arg1, %c0_i32 : i32, i32, i32
  }
}

module attributes {stable_mosaic.version = 11 : i64} {
  func.func @_fused_conv_kernel(%arg0: i32, %arg1: i32, %arg2: memref<1x1x176x8xf32, #tpu.memory_space<vmem>>, %arg3: memref<9x8x128xbf16, #tpu.memory_space<vmem>>, %arg4: memref<1x128xf32, #tpu.memory_space<vmem>>, %arg5: memref<1x128x8xbf16, #tpu.memory_space<vmem>>, %arg6: memref<8x128xbf16, #tpu.memory_space<vmem>>, %arg7: memref<1x128xf32, #tpu.memory_space<vmem>>, %arg8: memref<1x128x128xf32, #tpu.memory_space<vmem>>) attributes {dimension_semantics = [#tpu.dimension_semantics<parallel>, #tpu.dimension_semantics<arbitrary>], iteration_bounds = array<i64: 2, 1>, scalar_prefetch = 0 : i64, scratch_operands = 0 : i64, tpu.core_type = #tpu.core_type<tc>, window_params = [{transform_indices = @transform_0, window_bounds = array<i64: 1, 1, 176, 8>}, {pipeline_mode = #tpu.pipeline_mode<synchronous>, transform_indices = @transform_1, window_bounds = array<i64: 9, 8, 128>}, {pipeline_mode = #tpu.pipeline_mode<synchronous>, transform_indices = @transform_2, window_bounds = array<i64: 1, 128>}, {transform_indices = @transform_3, window_bounds = array<i64: 1, 128, 8>}, {pipeline_mode = #tpu.pipeline_mode<synchronous>, transform_indices = @transform_4, window_bounds = array<i64: 8, 128>}, {pipeline_mode = #tpu.pipeline_mode<synchronous>, transform_indices = @transform_5, window_bounds = array<i64: 1, 128>}, {transform_indices = @transform_6, window_bounds = array<i64: 1, 128, 128>}]} {
    %c0 = arith.constant 0 : index
    %c0_0 = arith.constant 0 : index
    %c0_1 = arith.constant 0 : index
    %c0_2 = arith.constant 0 : index
    %0 = vector.load %arg2[%c0, %c0_0, %c0_1, %c0_2] : memref<1x1x176x8xf32, #tpu.memory_space<vmem>>, vector<1x1x128x8xf32>
    %1 = vector.shape_cast %0 : vector<1x1x128x8xf32> to vector<128x8xf32>
    %2 = arith.truncf %1 : vector<128x8xf32> to vector<128x8xbf16>
    %c0_3 = arith.constant 0 : index
    %c0_4 = arith.constant 0 : index
    %c0_5 = arith.constant 0 : index
    %3 = vector.load %arg3[%c0_3, %c0_4, %c0_5] : memref<9x8x128xbf16, #tpu.memory_space<vmem>>, vector<1x8x128xbf16>
    %4 = vector.shape_cast %3 : vector<1x8x128xbf16> to vector<8x128xbf16>
    %cst = arith.constant dense<0.000000e+00> : vector<128x128xf32>
    %5 = tpu.matmul %2, %4, %cst {dimension_numbers = #tpu.dot_dimension_numbers<[1], [0], [0], [1], [0, 0, 1, 1], [], []>} : vector<128x8xbf16>, vector<8x128xbf16>, vector<128x128xf32> -> vector<128x128xf32>
    %c0_6 = arith.constant 0 : index
    %c0_7 = arith.constant 0 : index
    %c1 = arith.constant 1 : index
    %c0_8 = arith.constant 0 : index
    %6 = vector.load %arg2[%c0_6, %c0_7, %c1, %c0_8] : memref<1x1x176x8xf32, #tpu.memory_space<vmem>>, vector<1x1x128x8xf32>
    %7 = vector.shape_cast %6 : vector<1x1x128x8xf32> to vector<128x8xf32>
    %8 = arith.truncf %7 : vector<128x8xf32> to vector<128x8xbf16>
    %c1_9 = arith.constant 1 : index
    %c0_10 = arith.constant 0 : index
    %c0_11 = arith.constant 0 : index
    %9 = vector.load %arg3[%c1_9, %c0_10, %c0_11] : memref<9x8x128xbf16, #tpu.memory_space<vmem>>, vector<1x8x128xbf16>
    %10 = vector.shape_cast %9 : vector<1x8x128xbf16> to vector<8x128xbf16>
    %cst_12 = arith.constant dense<0.000000e+00> : vector<128x128xf32>
    %11 = tpu.matmul %8, %10, %cst_12 {dimension_numbers = #tpu.dot_dimension_numbers<[1], [0], [0], [1], [0, 0, 1, 1], [], []>} : vector<128x8xbf16>, vector<8x128xbf16>, vector<128x128xf32> -> vector<128x128xf32>
    %12 = arith.addf %5, %11 : vector<128x128xf32>
    %c0_13 = arith.constant 0 : index
    %c0_14 = arith.constant 0 : index
    %c2 = arith.constant 2 : index
    %c0_15 = arith.constant 0 : index
    %13 = vector.load %arg2[%c0_13, %c0_14, %c2, %c0_15] : memref<1x1x176x8xf32, #tpu.memory_space<vmem>>, vector<1x1x128x8xf32>
    %14 = vector.shape_cast %13 : vector<1x1x128x8xf32> to vector<128x8xf32>
    %15 = arith.truncf %14 : vector<128x8xf32> to vector<128x8xbf16>
    %c2_16 = arith.constant 2 : index
    %c0_17 = arith.constant 0 : index
    %c0_18 = arith.constant 0 : index
    %16 = vector.load %arg3[%c2_16, %c0_17, %c0_18] : memref<9x8x128xbf16, #tpu.memory_space<vmem>>, vector<1x8x128xbf16>
    %17 = vector.shape_cast %16 : vector<1x8x128xbf16> to vector<8x128xbf16>
    %cst_19 = arith.constant dense<0.000000e+00> : vector<128x128xf32>
    %18 = tpu.matmul %15, %17, %cst_19 {dimension_numbers = #tpu.dot_dimension_numbers<[1], [0], [0], [1], [0, 0, 1, 1], [], []>} : vector<128x8xbf16>, vector<8x128xbf16>, vector<128x128xf32> -> vector<128x128xf32>
    %19 = arith.addf %12, %18 : vector<128x128xf32>
    %c0_20 = arith.constant 0 : index
    %c0_21 = arith.constant 0 : index
    %c16 = arith.constant 16 : index
    %c0_22 = arith.constant 0 : index
    %20 = vector.load %arg2[%c0_20, %c0_21, %c16, %c0_22] : memref<1x1x176x8xf32, #tpu.memory_space<vmem>>, vector<1x1x128x8xf32>
    %21 = vector.shape_cast %20 : vector<1x1x128x8xf32> to vector<128x8xf32>
    %22 = arith.truncf %21 : vector<128x8xf32> to vector<128x8xbf16>
    %c3 = arith.constant 3 : index
    %c0_23 = arith.constant 0 : index
    %c0_24 = arith.constant 0 : index
    %23 = vector.load %arg3[%c3, %c0_23, %c0_24] : memref<9x8x128xbf16, #tpu.memory_space<vmem>>, vector<1x8x128xbf16>
    %24 = vector.shape_cast %23 : vector<1x8x128xbf16> to vector<8x128xbf16>
    %cst_25 = arith.constant dense<0.000000e+00> : vector<128x128xf32>
    %25 = tpu.matmul %22, %24, %cst_25 {dimension_numbers = #tpu.dot_dimension_numbers<[1], [0], [0], [1], [0, 0, 1, 1], [], []>} : vector<128x8xbf16>, vector<8x128xbf16>, vector<128x128xf32> -> vector<128x128xf32>
    %26 = arith.addf %19, %25 : vector<128x128xf32>
    %c0_26 = arith.constant 0 : index
    %c0_27 = arith.constant 0 : index
    %c17 = arith.constant 17 : index
    %c0_28 = arith.constant 0 : index
    %27 = vector.load %arg2[%c0_26, %c0_27, %c17, %c0_28] : memref<1x1x176x8xf32, #tpu.memory_space<vmem>>, vector<1x1x128x8xf32>
    %28 = vector.shape_cast %27 : vector<1x1x128x8xf32> to vector<128x8xf32>
    %29 = arith.truncf %28 : vector<128x8xf32> to vector<128x8xbf16>
    %c4 = arith.constant 4 : index
    %c0_29 = arith.constant 0 : index
    %c0_30 = arith.constant 0 : index
    %30 = vector.load %arg3[%c4, %c0_29, %c0_30] : memref<9x8x128xbf16, #tpu.memory_space<vmem>>, vector<1x8x128xbf16>
    %31 = vector.shape_cast %30 : vector<1x8x128xbf16> to vector<8x128xbf16>
    %cst_31 = arith.constant dense<0.000000e+00> : vector<128x128xf32>
    %32 = tpu.matmul %29, %31, %cst_31 {dimension_numbers = #tpu.dot_dimension_numbers<[1], [0], [0], [1], [0, 0, 1, 1], [], []>} : vector<128x8xbf16>, vector<8x128xbf16>, vector<128x128xf32> -> vector<128x128xf32>
    %33 = arith.addf %26, %32 : vector<128x128xf32>
    %c0_32 = arith.constant 0 : index
    %c0_33 = arith.constant 0 : index
    %c18 = arith.constant 18 : index
    %c0_34 = arith.constant 0 : index
    %34 = vector.load %arg2[%c0_32, %c0_33, %c18, %c0_34] : memref<1x1x176x8xf32, #tpu.memory_space<vmem>>, vector<1x1x128x8xf32>
    %35 = vector.shape_cast %34 : vector<1x1x128x8xf32> to vector<128x8xf32>
    %36 = arith.truncf %35 : vector<128x8xf32> to vector<128x8xbf16>
    %c5 = arith.constant 5 : index
    %c0_35 = arith.constant 0 : index
    %c0_36 = arith.constant 0 : index
    %37 = vector.load %arg3[%c5, %c0_35, %c0_36] : memref<9x8x128xbf16, #tpu.memory_space<vmem>>, vector<1x8x128xbf16>
    %38 = vector.shape_cast %37 : vector<1x8x128xbf16> to vector<8x128xbf16>
    %cst_37 = arith.constant dense<0.000000e+00> : vector<128x128xf32>
    %39 = tpu.matmul %36, %38, %cst_37 {dimension_numbers = #tpu.dot_dimension_numbers<[1], [0], [0], [1], [0, 0, 1, 1], [], []>} : vector<128x8xbf16>, vector<8x128xbf16>, vector<128x128xf32> -> vector<128x128xf32>
    %40 = arith.addf %33, %39 : vector<128x128xf32>
    %c0_38 = arith.constant 0 : index
    %c0_39 = arith.constant 0 : index
    %c32 = arith.constant 32 : index
    %c0_40 = arith.constant 0 : index
    %41 = vector.load %arg2[%c0_38, %c0_39, %c32, %c0_40] : memref<1x1x176x8xf32, #tpu.memory_space<vmem>>, vector<1x1x128x8xf32>
    %42 = vector.shape_cast %41 : vector<1x1x128x8xf32> to vector<128x8xf32>
    %43 = arith.truncf %42 : vector<128x8xf32> to vector<128x8xbf16>
    %c6 = arith.constant 6 : index
    %c0_41 = arith.constant 0 : index
    %c0_42 = arith.constant 0 : index
    %44 = vector.load %arg3[%c6, %c0_41, %c0_42] : memref<9x8x128xbf16, #tpu.memory_space<vmem>>, vector<1x8x128xbf16>
    %45 = vector.shape_cast %44 : vector<1x8x128xbf16> to vector<8x128xbf16>
    %cst_43 = arith.constant dense<0.000000e+00> : vector<128x128xf32>
    %46 = tpu.matmul %43, %45, %cst_43 {dimension_numbers = #tpu.dot_dimension_numbers<[1], [0], [0], [1], [0, 0, 1, 1], [], []>} : vector<128x8xbf16>, vector<8x128xbf16>, vector<128x128xf32> -> vector<128x128xf32>
    %47 = arith.addf %40, %46 : vector<128x128xf32>
    %c0_44 = arith.constant 0 : index
    %c0_45 = arith.constant 0 : index
    %c33 = arith.constant 33 : index
    %c0_46 = arith.constant 0 : index
    %48 = vector.load %arg2[%c0_44, %c0_45, %c33, %c0_46] : memref<1x1x176x8xf32, #tpu.memory_space<vmem>>, vector<1x1x128x8xf32>
    %49 = vector.shape_cast %48 : vector<1x1x128x8xf32> to vector<128x8xf32>
    %50 = arith.truncf %49 : vector<128x8xf32> to vector<128x8xbf16>
    %c7 = arith.constant 7 : index
    %c0_47 = arith.constant 0 : index
    %c0_48 = arith.constant 0 : index
    %51 = vector.load %arg3[%c7, %c0_47, %c0_48] : memref<9x8x128xbf16, #tpu.memory_space<vmem>>, vector<1x8x128xbf16>
    %52 = vector.shape_cast %51 : vector<1x8x128xbf16> to vector<8x128xbf16>
    %cst_49 = arith.constant dense<0.000000e+00> : vector<128x128xf32>
    %53 = tpu.matmul %50, %52, %cst_49 {dimension_numbers = #tpu.dot_dimension_numbers<[1], [0], [0], [1], [0, 0, 1, 1], [], []>} : vector<128x8xbf16>, vector<8x128xbf16>, vector<128x128xf32> -> vector<128x128xf32>
    %54 = arith.addf %47, %53 : vector<128x128xf32>
    %c0_50 = arith.constant 0 : index
    %c0_51 = arith.constant 0 : index
    %c34 = arith.constant 34 : index
    %c0_52 = arith.constant 0 : index
    %55 = vector.load %arg2[%c0_50, %c0_51, %c34, %c0_52] : memref<1x1x176x8xf32, #tpu.memory_space<vmem>>, vector<1x1x128x8xf32>
    %56 = vector.shape_cast %55 : vector<1x1x128x8xf32> to vector<128x8xf32>
    %57 = arith.truncf %56 : vector<128x8xf32> to vector<128x8xbf16>
    %c8 = arith.constant 8 : index
    %c0_53 = arith.constant 0 : index
    %c0_54 = arith.constant 0 : index
    %58 = vector.load %arg3[%c8, %c0_53, %c0_54] : memref<9x8x128xbf16, #tpu.memory_space<vmem>>, vector<1x8x128xbf16>
    %59 = vector.shape_cast %58 : vector<1x8x128xbf16> to vector<8x128xbf16>
    %cst_55 = arith.constant dense<0.000000e+00> : vector<128x128xf32>
    %60 = tpu.matmul %57, %59, %cst_55 {dimension_numbers = #tpu.dot_dimension_numbers<[1], [0], [0], [1], [0, 0, 1, 1], [], []>} : vector<128x8xbf16>, vector<8x128xbf16>, vector<128x128xf32> -> vector<128x128xf32>
    %61 = arith.addf %54, %60 : vector<128x128xf32>
    %c0_56 = arith.constant 0 : index
    %c0_57 = arith.constant 0 : index
    %62 = vector.load %arg4[%c0_56, %c0_57] : memref<1x128xf32, #tpu.memory_space<vmem>>, vector<1x128xf32>
    %63 = vector.broadcast %62 : vector<1x128xf32> to vector<128x128xf32>
    %64 = arith.addf %61, %63 : vector<128x128xf32>
    %c0_58 = arith.constant 0 : index
    %c0_59 = arith.constant 0 : index
    %c0_60 = arith.constant 0 : index
    %65 = vector.load %arg5[%c0_58, %c0_59, %c0_60] : memref<1x128x8xbf16, #tpu.memory_space<vmem>>, vector<1x128x8xbf16>
    %66 = vector.shape_cast %65 : vector<1x128x8xbf16> to vector<128x8xbf16>
    %c0_61 = arith.constant 0 : index
    %c0_62 = arith.constant 0 : index
    %67 = vector.load %arg6[%c0_61, %c0_62] : memref<8x128xbf16, #tpu.memory_space<vmem>>, vector<8x128xbf16>
    %cst_63 = arith.constant dense<0.000000e+00> : vector<128x128xf32>
    %68 = tpu.matmul %66, %67, %cst_63 {dimension_numbers = #tpu.dot_dimension_numbers<[1], [0], [0], [1], [0, 0, 1, 1], [], []>} : vector<128x8xbf16>, vector<8x128xbf16>, vector<128x128xf32> -> vector<128x128xf32>
    %69 = arith.addf %64, %68 : vector<128x128xf32>
    %c0_64 = arith.constant 0 : index
    %c0_65 = arith.constant 0 : index
    %70 = vector.load %arg7[%c0_64, %c0_65] : memref<1x128xf32, #tpu.memory_space<vmem>>, vector<1x128xf32>
    %71 = vector.broadcast %70 : vector<1x128xf32> to vector<128x128xf32>
    %72 = arith.addf %69, %71 : vector<128x128xf32>
    %cst_66 = arith.constant 0.000000e+00 : f32
    %73 = vector.broadcast %cst_66 : f32 to vector<128x128xf32>
    %74 = arith.maximumf %72, %73 : vector<128x128xf32>
    %c0_67 = arith.constant 0 : index
    %c0_68 = arith.constant 0 : index
    %c0_69 = arith.constant 0 : index
    %75 = vector.load %arg8[%c0_67, %c0_68, %c0_69] : memref<1x128x128xf32, #tpu.memory_space<vmem>>, vector<1x128x128xf32>
    %76 = vector.shape_cast %75 : vector<1x128x128xf32> to vector<128x128xf32>
    %77 = vector.shape_cast %74 : vector<128x128xf32> to vector<1x128x128xf32>
    tpu.vector_store %arg8[%c0_67, %c0_68, %c0_69], %77 {strides = array<i32>} : memref<1x128x128xf32, #tpu.memory_space<vmem>>, vector<1x128x128xf32>,
    return
  }
  func.func @transform_0(%arg0: i32, %arg1: i32) -> (i32, i32, i32, i32) {
    %c0_i32 = arith.constant 0 : i32
    %c0_i32_0 = arith.constant 0 : i32
    %c0_i32_1 = arith.constant 0 : i32
    %c0_i32_2 = arith.constant 0 : i32
    return %arg0, %c0_i32, %c0_i32_0, %c0_i32_1 : i32, i32, i32, i32
  }
  func.func @transform_1(%arg0: i32, %arg1: i32) -> (i32, i32, i32) {
    %c0_i32 = arith.constant 0 : i32
    %c0_i32_0 = arith.constant 0 : i32
    %c0_i32_1 = arith.constant 0 : i32
    %c0_i32_2 = arith.constant 0 : i32
    return %c0_i32, %c0_i32_0, %c0_i32_1 : i32, i32, i32
  }
  func.func @transform_2(%arg0: i32, %arg1: i32) -> (i32, i32) {
    %c0_i32 = arith.constant 0 : i32
    %c0_i32_0 = arith.constant 0 : i32
    %c0_i32_1 = arith.constant 0 : i32
    return %c0_i32, %c0_i32_0 : i32, i32
  }
  func.func @transform_3(%arg0: i32, %arg1: i32) -> (i32, i32, i32) {
    %c0_i32 = arith.constant 0 : i32
    %c0_i32_0 = arith.constant 0 : i32
    return %arg0, %arg1, %c0_i32 : i32, i32, i32
  }
  func.func @transform_4(%arg0: i32, %arg1: i32) -> (i32, i32) {
    %c0_i32 = arith.constant 0 : i32
    %c0_i32_0 = arith.constant 0 : i32
    %c0_i32_1 = arith.constant 0 : i32
    return %c0_i32, %c0_i32_0 : i32, i32
  }
  func.func @transform_5(%arg0: i32, %arg1: i32) -> (i32, i32) {
    %c0_i32 = arith.constant 0 : i32
    %c0_i32_0 = arith.constant 0 : i32
    %c0_i32_1 = arith.constant 0 : i32
    return %c0_i32, %c0_i32_0 : i32, i32
  }
  func.func @transform_6(%arg0: i32, %arg1: i32) -> (i32, i32, i32) {
    %c0_i32 = arith.constant 0 : i32
    %c0_i32_0 = arith.constant 0 : i32
    return %arg0, %arg1, %c0_i32 : i32, i32, i32
  }
}

</mosaic_0001>

<bundles_post_ra>
// kernel: residual_block.2
= control target key start
LH: loop header
LB: loop body
LE: loop exit
PB: predicated region body
PF: predicated region fallthrough
CT: control target
= control target key end

     0   :  { %s2421_s12 = smov 0   ;;  %s2423_s13 = smov 0   ;;  %s2784_s0 = inlined_call_operand.vmem [shape: f32[2,4,160,8], index: 0, kind: input, shape index: {}]   ;;  %s2785_s1 = inlined_call_operand.vmem [shape: bf16[9,8,128], index: 1, kind: input, shape index: {}]   ;;  %s2786_s2 = inlined_call_operand.vmem [shape: f32[1,128], index: 2, kind: input, shape index: {}]   ;;  %s2787_s3 = inlined_call_operand.vmem [shape: f32[2,128,128], index: 3, kind: output, shape index: {}]  }
   0x1   :  { %s2425_s14 = smov 0  }
   0x2 LB: > { %s25_s15 = sadd.s32 1, %s2395_s13  ;;  %p1801_p0 = scmp.ge.s32.totalorder %s2399_s14, 1  ;;  %s2399_s14 = sphi %s2425_s14, %s13_s14   ;;  %s2395_s13 = sphi %s2423_s13, %s2789_s13   ;;  %s2391_s12 = sphi %s2421_s12, %s2788_s12  }
   0x3   : > { %p27_p1 = scmp.ge.s32.totalorder %s25_s15, 2  ;;  %p151_p2 = scmp.lt.s32.totalorder %s2399_s14, 3 }
   0x5   : > { %s2791_s15 = smov (%p27_p1, %s25_s15), 0  ;;  %p152_p3 = pnand %p1801_p0, %p151_p2 }
   0x6   : > { %v1821_v0 = vld [vmem:[%s2785_s1 + $0x4] sm:$0xf] (!%p152_p3)  ;;  %vm272_vm0 = vcmask (!%p152_p3), 1043456   ;;  %v2445_v1 = vld [vmem:[%s2785_s1 + $0x10] sm:$0xf] (!%p152_p3)  ;;  %p179_p4 = scmp.lt.s32.totalorder (!%p152_p3), %s2391_s12, 1 }
   0x7   : > { %155 = sbr.rel (%p152_p3) target bundleno = 381 (0x17d), region = 32  ;;  %2342 = vmatprep.subr.msk.bf16.mxu1 (!%p152_p3), %vm272_vm0, %v1821_v0  ;;  %2346 = vmatprep.subr.msk.bf16.mxu0 (!%p152_p3), %vm272_vm0, %v2445_v1  ;;  %v274_v2 = vsel (!%p152_p3), %vm272_vm0, %v1821_v0, 0  ;;  %v2453_v3 = vsel (!%p152_p3), %vm272_vm0, %v2445_v1, 0  ;;  %v219_v4 = vld [vmem:[%s2785_s1] sm:$0xf] (!%p152_p3)  ;;  %vm247_vm1 = vcmask (!%p152_p3), 64512  }
   0x8   : > { %2051 = vmatpush3.bf16.msra.mxu1 (!%p152_p3), %v274_v2  ;;  %2123 = vmatpush3.bf16.msra.mxu0 (!%p152_p3), %v2453_v3  ;;  %v1913_v5 = vld [vmem:[%s2785_s1 + $0x14] sm:$0xf] (!%p152_p3)  ;;  %v398_v15 = vsel (!%p152_p3), %vm272_vm0, %v219_v4, 0  ;;  %v1922_v26 = vld [vmem:[%s2785_s1 + $0x18] sm:$0xf] (!%p152_p3) }
   0x9   : > { %2343 = vmatprep.subr.msk.bf16.mxu1 (!%p152_p3), %vm272_vm0, %v219_v4  ;;  %2348 = vmatprep.subr.msk.bf16.mxu0 (!%p152_p3), %vm272_vm0, %v1913_v5  ;;  %v1048_v20 = vsel (!%p152_p3), %vm272_vm0, %v1913_v5, 0  ;;  %v2500_v27 = vld [vmem:[%s2785_s1 + $0x8] sm:$0xf] (!%p152_p3)  ;;  %v1214_v52 = vsel (!%p152_p3), %vm272_vm0, %v1922_v26, 0  ;;  %v1947_v53 = vld [vmem:[%s2785_s1 + $0x1c] sm:$0xf] (!%p152_p3) }
   0xe   : > { %s2793_s12 = smov (!%p179_p4, %s2391_s12), 1 }
   0xf   : > { %s2352_s24 = smul.u32 640, %s2793_s12  ;;  %s1968_s17 = sshll.u32 %s2793_s12, 7 }
  0x10   : > { %s2742_s20 = scalar_lea.vmem %s2787_s3, %s1968_s17 }
  0x11   : > { %s2470_s27 = scalar_lea.vmem %s2784_s0, %s2352_s24 }
  0x12   : > { %v1805_v6 = vld [vmem:[%s2470_s27 + $0xa0] sm:$0xff]  ;;  %v1806_v7 = vld [vmem:[%s2470_s27 + $0xa8] sm:$0xff]  ;;  %v1807_v11 = vld [vmem:[%s2470_s27 + $0xb0] sm:$0xff] }
  0x13   : > { %v1872_v8 = vld [vmem:[%s2470_s27 + $0x1e0] sm:$0xff]  ;;  %v237_v9 = vpack.c.bf16 %v1806_v7, %v1805_v6  ;;  %v1873_v10 = vld [vmem:[%s2470_s27 + $0x1e8] sm:$0xff]  ;;  %v1808_v12 = vld [vmem:[%s2470_s27 + $0xb8] sm:$0xff] }
  0x14   : > { %v847_v13 = vpack.c.bf16 %v1873_v10, %v1872_v8  ;;  %v2478_v14 = vpack.c.bf16 %v1808_v12, %v1807_v11  ;;  %v1874_v16 = vld [vmem:[%s2470_s27 + $0x1f0] sm:$0xff]  ;;  %v1875_v17 = vld [vmem:[%s2470_s27 + $0x1f8] sm:$0xff]  ;;  %v1809_v18 = vld [vmem:[%s2470_s27 + $0xc0] sm:$0xff] }
  0x15   : > { %2052 = vmatprep.mubr.msk.bf16.mxu1 %vm247_vm1, %v237_v9  ;;  %v848_v19 = vpack.c.bf16 %v1875_v17, %v1874_v16  ;;  %v1810_v21 = vld [vmem:[%s2470_s27 + $0xc8] sm:$0xff]  ;;  %v1876_v22 = vld [vmem:[%s2470_s27 + $0x200] sm:$0xff]  ;;  %v1811_v28 = vld [vmem:[%s2470_s27 + $0xd0] sm:$0xff] }
  0x16   : > { %v1877_v23 = vld [vmem:[%s2470_s27 + $0x208] sm:$0xff]  ;;  %2124 = vmatprep.mubr.msk.bf16.mxu0 %vm247_vm1, %v847_v13  ;;  %2053 = vmatmul.mubr.msk.bf16.vlgmr.msra.gmra.mrb[0].mxu1 %vm247_vm1, %v2478_v14  ;;  %v2492_v24 = vpack.c.bf16 %v1810_v21, %v1809_v18  ;;  %v1812_v29 = vld [vmem:[%s2470_s27 + $0xd8] sm:$0xff]  ;;  %v1878_v30 = vld [vmem:[%s2470_s27 + $0x210] sm:$0xff] }
  0x17   : > { %v849_v25 = vpack.c.bf16 %v1877_v23, %v1876_v22  ;;  %2069 = vmatpush3.bf16.msra.mxu1 %v398_v15  ;;  %2125 = vmatmul.mubr.msk.bf16.vlgmr.msra.gmra.mrb[0].mxu0 %vm247_vm1, %v848_v19  ;;  %v1879_v31 = vld [vmem:[%s2470_s27 + $0x218] sm:$0xff]  ;;  %v1813_v32 = vld [vmem:[%s2470_s27 + $0xe0] sm:$0xff]  ;;  %v1814_v33 = vld [vmem:[%s2470_s27 + $0xe8] sm:$0xff]  ;;  %v2515_v36 = vpack.c.bf16 %v1812_v29, %v1811_v28  ;;  %v548_v15 = vsel %vm272_vm0, %v2500_v27, 0 }
  0x18   : > { %2141 = vmatpush3.bf16.msra.mxu0 %v1048_v20  ;;  %2056 = vmatprep.mubr.msk.bf16.mxu1 %vm247_vm1, %v2492_v24  ;;  %v1897_v34 = vld [vmem:[%s2470_s27 + $0x141] sm:$0xff]  ;;  %v1898_v35 = vld [vmem:[%s2470_s27 + $0x149] sm:$0xff]  ;;  %v850_v37 = vpack.c.bf16 %v1879_v31, %v1878_v30  ;;  %v2519_v38 = vpack.c.bf16 %v1814_v33, %v1813_v32  ;;  %v1816_v41 = vld [vmem:[%s2470_s27 + $0xf8] sm:$0xff] }
  0x19   : > { %2128 = vmatprep.mubr.msk.bf16.mxu0 %vm247_vm1, %v849_v25  ;;  %2349 = vmatprep.subr.msk.bf16.mxu0 %vm272_vm0, %v1922_v26  ;;  %v1013_v39 = vpack.c.bf16 %v1898_v35, %v1897_v34  ;;  %v1815_v40 = vld [vmem:[%s2470_s27 + $0xf0] sm:$0xff]  ;;  %v1900_v43 = vld [vmem:[%s2470_s27 + $0x159] sm:$0xff]  ;;  %v1818_v45 = vld [vmem:[%s2470_s27 + $0x108] sm:$0xff]  ;;  %v1380_v35 = vsel %vm272_vm0, %v1947_v53, 0 }
  0x1a   : > { %2344 = vmatprep.subr.msk.bf16.mxu1 %vm272_vm0, %v2500_v27  ;;  %v1899_v42 = vld [vmem:[%s2470_s27 + $0x151] sm:$0xff]  ;;  %v1817_v44 = vld [vmem:[%s2470_s27 + $0x100] sm:$0xff]  ;;  %v1902_v47 = vld [vmem:[%s2470_s27 + $0x169] sm:$0xff]  ;;  %v2535_v48 = vpack.c.bf16 %v1816_v41, %v1815_v40 }
  0x1b   : > { %v1901_v46 = vld [vmem:[%s2470_s27 + $0x161] sm:$0xff]  ;;  %v1014_v49 = vpack.c.bf16 %v1900_v43, %v1899_v42  ;;  %v2537_v50 = vpack.c.bf16 %v1818_v45, %v1817_v44  ;;  %v1819_v54 = vld [vmem:[%s2470_s27 + $0x110] sm:$0xff]  ;;  %v1820_v55 = vld [vmem:[%s2470_s27 + $0x118] sm:$0xff] }
  0x1c   : > { %v1015_v51 = vpack.c.bf16 %v1902_v47, %v1901_v46  ;;  %v1903_v56 = vld [vmem:[%s2470_s27 + $0x171] sm:$0xff]  ;;  %v1904_v57 = vld [vmem:[%s2470_s27 + $0x179] sm:$0xff]  ;;  %v196_v59 = vld [vmem:[%s2470_s27 + $0x8] sm:$0xff]  ;;  %v2558_v62 = vpack.c.bf16 %v1820_v55, %v1819_v54 }
  0x1d   : > { %v195_v58 = vld [vmem:[%s2470_s27] sm:$0xff]  ;;  %v1906_v61 = vld [vmem:[%s2470_s27 + $0x189] sm:$0xff]  ;;  %v1016_v63 = vpack.c.bf16 %v1904_v57, %v1903_v56  ;;  %v198_v5 = vld [vmem:[%s2470_s27 + $0x18] sm:$0xff] }
  0x1e   : > { %2057 = vmatmul.mubr.msk.bf16.gmra.mrb[4].mxu1 %vm247_vm1, %v2515_v36  ;;  %v1905_v60 = vld [vmem:[%s2470_s27 + $0x181] sm:$0xff]  ;;  %v211_v0 = vpack.c.bf16 %v196_v59, %v195_v58  ;;  %v197_v4 = vld [vmem:[%s2470_s27 + $0x10] sm:$0xff]  ;;  %v1908_v7 = vld [vmem:[%s2470_s27 + $0x199] sm:$0xff] }
  0x1f   : > { %2129 = vmatmul.mubr.msk.bf16.gmra.mrb[4].mxu0 %vm247_vm1, %v850_v37  ;;  %2060 = vmatprep.mubr.msk.bf16.mxu1 %vm247_vm1, %v2519_v38  ;;  %v1017_v2 = vpack.c.bf16 %v1906_v61, %v1905_v60  ;;  %v1907_v6 = vld [vmem:[%s2470_s27 + $0x191] sm:$0xff]  ;;  %v199_v8 = vld [vmem:[%s2470_s27 + $0x20] sm:$0xff]  ;;  %v200_v9 = vld [vmem:[%s2470_s27 + $0x28] sm:$0xff]  ;;  %v212_v12 = vpack.c.bf16 %v198_v5, %v197_v4 }
  0x20   : > { %2142 = vmatprep.mubr.msk.bf16.mxu0 %vm247_vm1, %v1013_v39  ;;  %v1909_v10 = vld [vmem:[%s2470_s27 + $0x1a1] sm:$0xff]  ;;  %v1910_v11 = vld [vmem:[%s2470_s27 + $0x1a9] sm:$0xff]  ;;  %v1018_v13 = vpack.c.bf16 %v1908_v7, %v1907_v6  ;;  %v213_v16 = vpack.c.bf16 %v200_v9, %v199_v8  ;;  %v202_v20 = vld [vmem:[%s2470_s27 + $0x38] sm:$0xff] }
  0x21   : > { %v1019_v17 = vpack.c.bf16 %v1910_v11, %v1909_v10  ;;  %v1863_v18 = vld [vmem:[%s2785_s1 + $0xc] sm:$0xf]  ;;  %v201_v19 = vld [vmem:[%s2470_s27 + $0x30] sm:$0xff]  ;;  %v1912_v22 = vld [vmem:[%s2470_s27 + $0x1b9] sm:$0xff] }
  0x22   : > { %v1911_v21 = vld [vmem:[%s2470_s27 + $0x1b1] sm:$0xff]  ;;  %v203_v23 = vld [vmem:[%s2470_s27 + $0x40] sm:$0xff]  ;;  %v204_v25 = vld [vmem:[%s2470_s27 + $0x48] sm:$0xff]  ;;  %v214_v26 = vpack.c.bf16 %v202_v20, %v201_v19 }
  0x23   : > { %v1020_v27 = vpack.c.bf16 %v1912_v22, %v1911_v21  ;;  %v215_v28 = vpack.c.bf16 %v204_v25, %v203_v23  ;;  %v205_v29 = vld [vmem:[%s2470_s27 + $0x50] sm:$0xff]  ;;  %v206_v30 = vld [vmem:[%s2470_s27 + $0x58] sm:$0xff]  ;;  %v207_v31 = vld [vmem:[%s2470_s27 + $0x60] sm:$0xff] }
  0x24   : > { %v208_v32 = vld [vmem:[%s2470_s27 + $0x68] sm:$0xff]  ;;  %v216_v33 = vpack.c.bf16 %v206_v30, %v205_v29  ;;  %v1956_v37 = vld [vmem:[%s2785_s1 + $0x20] sm:$0xf]  ;;  %v209_v39 = vld [vmem:[%s2470_s27 + $0x70] sm:$0xff] }
  0x25   : > { %v217_v34 = vpack.c.bf16 %v208_v32, %v207_v31  ;;  %v210_v40 = vld [vmem:[%s2470_s27 + $0x78] sm:$0xff]  ;;  %v497_v41 = vld [vmem:[%s2470_s27 + $0x1] sm:$0xff]  ;;  %v498_v42 = vld [vmem:[%s2470_s27 + $0x9] sm:$0xff]  ;;  %v1546_v7 = vsel %vm272_vm0, %v1956_v37, 0 }
  0x26   : > { %2061 = vmatmul.mubr.msk.bf16.gmra.mrb[8].mxu1 %vm247_vm1, %v2535_v48  ;;  %v218_v43 = vpack.c.bf16 %v210_v40, %v209_v39  ;;  %v513_v44 = vpack.c.bf16 %v498_v42, %v497_v41  ;;  %v499_v45 = vld [vmem:[%s2470_s27 + $0x11] sm:$0xff]  ;;  %v500_v46 = vld [vmem:[%s2470_s27 + $0x19] sm:$0xff]  ;;  %v501_v47 = vld [vmem:[%s2470_s27 + $0x21] sm:$0xff] }
  0x27   : > { %2143 = vmatmul.mubr.msk.bf16.vlgmr.msra.gmra.mrb[0].mxu0 %vm247_vm1, %v1014_v49  ;;  %2064 = vmatprep.mubr.msk.bf16.mxu1 %vm247_vm1, %v2537_v50  ;;  %v502_v49 = vld [vmem:[%s2470_s27 + $0x29] sm:$0xff]  ;;  %v503_v54 = vld [vmem:[%s2470_s27 + $0x31] sm:$0xff]  ;;  %v504_v55 = vld [vmem:[%s2470_s27 + $0x39] sm:$0xff] }
  0x28   : > { %2159 = vmatpush3.bf16.msra.mxu0 %v1214_v52  ;;  %2146 = vmatprep.mubr.msk.bf16.mxu0 %vm247_vm1, %v1015_v51  ;;  %v2618_v51 = vpack.c.bf16 %v500_v46, %v499_v45  ;;  %v715_v52 = vsel %vm272_vm0, %v1863_v18, 0  ;;  %v1177_v56 = vld [vmem:[%s2470_s27 + $0x80] sm:$0xff]  ;;  %v1178_v57 = vld [vmem:[%s2470_s27 + $0x88] sm:$0xff]  ;;  %v2637_v60 = vpack.c.bf16 %v504_v55, %v503_v54  ;;  %v1858_v25 = vld [vmem:[%s2470_s27 + $0x198] sm:$0xff] }
  0x29   : > { %2350 = vmatprep.subr.msk.bf16.mxu0 %vm272_vm0, %v1947_v53  ;;  %v2621_v53 = vpack.c.bf16 %v502_v49, %v501_v47  ;;  %v505_v58 = vld [vmem:[%s2470_s27 + $0x41] sm:$0xff]  ;;  %v506_v59 = vld [vmem:[%s2470_s27 + $0x49] sm:$0xff]  ;;  %v1186_v61 = vpack.c.bf16 %v1178_v57, %v1177_v56  ;;  %v512_v8 = vld [vmem:[%s2470_s27 + $0x79] sm:$0xff] }
  0x2a   : > { %v510_v4 = vld [vmem:[%s2470_s27 + $0x69] sm:$0xff]  ;;  %v1847_v9 = vld [vmem:[%s2470_s27 + $0x140] sm:$0xff]  ;;  %v1862_v30 = vld [vmem:[%s2470_s27 + $0x1b8] sm:$0xff] }
  0x2b   : > { %v1848_v10 = vld [vmem:[%s2470_s27 + $0x148] sm:$0xff]  ;;  %v1945_v19 = vld [vmem:[%s2470_s27 + $0x120] sm:$0xff]  ;;  %v1861_v29 = vld [vmem:[%s2470_s27 + $0x1b0] sm:$0xff] }
  0x2c   : > { %v1855_v20 = vld [vmem:[%s2470_s27 + $0x180] sm:$0xff]  ;;  %v1856_v21 = vld [vmem:[%s2470_s27 + $0x188] sm:$0xff] }
  0x2d   : > { %v684_v23 = vpack.c.bf16 %v1856_v21, %v1855_v20  ;;  %v1880_v31 = vld [vmem:[%s2470_s27 + $0x220] sm:$0xff]  ;;  %v1881_v32 = vld [vmem:[%s2470_s27 + $0x228] sm:$0xff] }
  0x2e   : > { %2065 = vmatmul.mubr.msk.bf16.gmra.mrb[12].mxu1 %vm247_vm1, %v2558_v62  ;;  %v1884_v39 = vld [vmem:[%s2470_s27 + $0x240] sm:$0xff]  ;;  %v1885_v40 = vld [vmem:[%s2470_s27 + $0x248] sm:$0xff] }
  0x2f   : > { %2147 = vmatmul.mubr.msk.bf16.gmra.mrb[4].mxu0 %vm247_vm1, %v1016_v63  ;;  %2070 = vmatprep.mubr.msk.bf16.mxu1 %vm247_vm1, %v211_v0  ;;  %v2639_v63 = vpack.c.bf16 %v506_v59, %v505_v58  ;;  %v507_v0 = vld [vmem:[%s2470_s27 + $0x51] sm:$0xff]  ;;  %v853_v42 = vpack.c.bf16 %v1885_v40, %v1884_v39  ;;  %v1509_v45 = vld [vmem:[%s2470_s27 + $0x81] sm:$0xff]  ;;  %v1510_v46 = vld [vmem:[%s2470_s27 + $0x89] sm:$0xff] }
  0x30   : > { %2150 = vmatprep.mubr.msk.bf16.mxu0 %vm247_vm1, %v1017_v2  ;;  %v508_v2 = vld [vmem:[%s2470_s27 + $0x59] sm:$0xff]  ;;  %v1518_v49 = vpack.c.bf16 %v1510_v46, %v1509_v45 }
  0x31   : > { %v2652_v5 = vpack.c.bf16 %v508_v2, %v507_v0 }
  0x36   : > { %2071 = vmatmul.mubr.msk.bf16.vlgmr.msra.gmra.mrb[0].mxu1 %vm247_vm1, %v212_v12 }
  0x37   : > { %2087 = vmatpush3.bf16.msra.mxu1 %v548_v15  ;;  %2151 = vmatmul.mubr.msk.bf16.gmra.mrb[8].mxu0 %vm247_vm1, %v1018_v13  ;;  %v1850_v13 = vld [vmem:[%s2470_s27 + $0x158] sm:$0xff]  ;;  %v1852_v15 = vld [vmem:[%s2470_s27 + $0x168] sm:$0xff] }
  0x38   : > { %2074 = vmatprep.mubr.msk.bf16.mxu1 %vm247_vm1, %v213_v16  ;;  %2154 = vmatprep.mubr.msk.bf16.mxu0 %vm247_vm1, %v1019_v17 }
  0x39   : > { %2345 = vmatprep.subr.msk.bf16.mxu1 %vm272_vm0, %v1863_v18  ;;  %v1854_v18 = vld [vmem:[%s2470_s27 + $0x178] sm:$0xff] }
  0x3e   : > { %2075 = vmatmul.mubr.msk.bf16.gmra.mrb[4].mxu1 %vm247_vm1, %v214_v26 }
  0x3f   : > { %2155 = vmatmul.mubr.msk.bf16.gmra.mrb[12].mxu0 %vm247_vm1, %v1020_v27  ;;  %2078 = vmatprep.mubr.msk.bf16.mxu1 %vm247_vm1, %v215_v28 }
  0x40   : > { %2160 = vmatprep.mubr.msk.bf16.mxu0 %vm247_vm1, %v212_v12  ;;  %v680_v12 = vpack.c.bf16 %v1848_v10, %v1847_v9 }
  0x46   : > { %2079 = vmatmul.mubr.msk.bf16.gmra.mrb[8].mxu1 %vm247_vm1, %v216_v33 }
  0x47   : > { %2161 = vmatmul.mubr.msk.bf16.vlgmr.msra.gmra.mrb[0].mxu0 %vm247_vm1, %v213_v16  ;;  %2082 = vmatprep.mubr.msk.bf16.mxu1 %vm247_vm1, %v217_v34 }
  0x48   : > { %2177 = vmatpush3.bf16.msra.mxu0 %v1380_v35  ;;  %2164 = vmatprep.mubr.msk.bf16.mxu0 %vm247_vm1, %v214_v26  ;;  %v1860_v26 = vld [vmem:[%s2470_s27 + $0x1a8] sm:$0xff]  ;;  %v1882_v35 = vld [vmem:[%s2470_s27 + $0x230] sm:$0xff] }
  0x49   : > { %2351 = vmatprep.subr.msk.bf16.mxu0 %vm272_vm0, %v1956_v37  ;;  %v1883_v37 = vld [vmem:[%s2470_s27 + $0x238] sm:$0xff] }
  0x4a   : > { %v852_v41 = vpack.c.bf16 %v1883_v37, %v1882_v35 }
  0x4e   : > { %2083 = vmatmul.mubr.msk.bf16.gmra.mrb[12].mxu1 %vm247_vm1, %v218_v43 }
  0x4f   : > { %2165 = vmatmul.mubr.msk.bf16.gmra.mrb[4].mxu0 %vm247_vm1, %v215_v28  ;;  %2088 = vmatprep.mubr.msk.bf16.mxu1 %vm247_vm1, %v513_v44  ;;  %v1887_v44 = vld [vmem:[%s2470_s27 + $0x258] sm:$0xff] }
  0x50   : > { %2168 = vmatprep.mubr.msk.bf16.mxu0 %vm247_vm1, %v216_v33  ;;  %v687_v33 = vpack.c.bf16 %v1862_v30, %v1861_v29 }
  0x56   : > { %2089 = vmatmul.mubr.msk.bf16.vlgmr.msra.gmra.mrb[0].mxu1 %vm247_vm1, %v2618_v51 }
  0x57   : > { %2105 = vmatpush3.bf16.msra.mxu1 %v715_v52  ;;  %2169 = vmatmul.mubr.msk.bf16.gmra.mrb[8].mxu0 %vm247_vm1, %v217_v34  ;;  %v851_v34 = vpack.c.bf16 %v1881_v32, %v1880_v31 }
  0x58   : > { %2092 = vmatprep.mubr.msk.bf16.mxu1 %vm247_vm1, %v2621_v53  ;;  %2172 = vmatprep.mubr.msk.bf16.mxu0 %vm247_vm1, %v218_v43  ;;  %v1886_v43 = vld [vmem:[%s2470_s27 + $0x250] sm:$0xff] }
  0x59   : > { %2347 = vmatprep.subr.msk.bf16.mxu1 %vm272_vm0, %v2445_v1  ;;  %v509_v1 = vld [vmem:[%s2470_s27 + $0x61] sm:$0xff]  ;;  %v854_v47 = vpack.c.bf16 %v1887_v44, %v1886_v43 }
  0x5a   : > { %v2654_v6 = vpack.c.bf16 %v510_v4, %v509_v1 }
  0x5e   : > { %2093 = vmatmul.mubr.msk.bf16.gmra.mrb[4].mxu1 %vm247_vm1, %v2637_v60 }
  0x5f   : > { %2173 = vmatmul.mubr.msk.bf16.gmra.mrb[12].mxu0 %vm247_vm1, %v1186_v61  ;;  %2096 = vmatprep.mubr.msk.bf16.mxu1 %vm247_vm1, %v2639_v63 }
  0x60   : > { %2178 = vmatprep.mubr.msk.bf16.mxu0 %vm247_vm1, %v2478_v14  ;;  %v511_v14 = vld [vmem:[%s2470_s27 + $0x71] sm:$0xff] }
  0x61   : > { %v520_v11 = vpack.c.bf16 %v512_v8, %v511_v14 }
  0x66   : > { %2097 = vmatmul.mubr.msk.bf16.gmra.mrb[8].mxu1 %vm247_vm1, %v2652_v5 }
  0x67   : > { %2179 = vmatmul.mubr.msk.bf16.vlgmr.msra.gmra.mrb[0].mxu0 %vm247_vm1, %v2492_v24  ;;  %2100 = vmatprep.mubr.msk.bf16.mxu1 %vm247_vm1, %v2654_v6  ;;  %v1849_v24 = vld [vmem:[%s2470_s27 + $0x150] sm:$0xff] }
  0x68   : > { %2195 = vmatpush3.bf16.msra.mxu0 %v1546_v7  ;;  %2182 = vmatprep.mubr.msk.bf16.mxu0 %vm247_vm1, %v2515_v36  ;;  %v1851_v36 = vld [vmem:[%s2470_s27 + $0x160] sm:$0xff]  ;;  %v681_v16 = vpack.c.bf16 %v1850_v13, %v1849_v24 }
  0x69   : > { %v682_v17 = vpack.c.bf16 %v1852_v15, %v1851_v36 }
  0x6e   : > { %2101 = vmatmul.mubr.msk.bf16.gmra.mrb[12].mxu1 %vm247_vm1, %v520_v11 }
  0x6f   : > { %2183 = vmatmul.mubr.msk.bf16.gmra.mrb[4].mxu0 %vm247_vm1, %v2519_v38  ;;  %2106 = vmatprep.mubr.msk.bf16.mxu1 %vm247_vm1, %v680_v12  ;;  %v1853_v38 = vld [vmem:[%s2470_s27 + $0x170] sm:$0xff] }
  0x70   : > { %2186 = vmatprep.mubr.msk.bf16.mxu0 %vm247_vm1, %v2535_v48  ;;  %v1946_v48 = vld [vmem:[%s2470_s27 + $0x128] sm:$0xff]  ;;  %v683_v22 = vpack.c.bf16 %v1854_v18, %v1853_v38 }
  0x76   : > { %2107 = vmatmul.mubr.msk.bf16.vlgmr.msra.gmra.mrb[0].mxu1 %vm247_vm1, %v681_v16 }
  0x77   : > { %2213 = vmatpush3.bf16.msra.mxu1 %v2453_v3  ;;  %2187 = vmatmul.mubr.msk.bf16.gmra.mrb[8].mxu0 %vm247_vm1, %v2537_v50  ;;  %v1352_v3 = vpack.c.bf16 %v1946_v48, %v1945_v19  ;;  %v1857_v50 = vld [vmem:[%s2470_s27 + $0x190] sm:$0xff] }
  0x78   : > { %2110 = vmatprep.mubr.msk.bf16.mxu1 %vm247_vm1, %v682_v17  ;;  %2190 = vmatprep.mubr.msk.bf16.mxu0 %vm247_vm1, %v2558_v62  ;;  %v1859_v62 = vld [vmem:[%s2470_s27 + $0x1a0] sm:$0xff]  ;;  %v685_v27 = vpack.c.bf16 %v1858_v25, %v1857_v50 }
  0x79   : > { %v686_v28 = vpack.c.bf16 %v1860_v26, %v1859_v62 }
  0x7e   : > { %2111 = vmatmul.mubr.msk.bf16.gmra.mrb[4].mxu1 %vm247_vm1, %v683_v22 }
  0x7f   : > { %2191 = vmatmul.mubr.msk.bf16.gmra.mrb[12].mxu0 %vm247_vm1, %v1352_v3  ;;  %2114 = vmatprep.mubr.msk.bf16.mxu1 %vm247_vm1, %v684_v23 }
  0x80   : > { %2196 = vmatprep.mubr.msk.bf16.mxu0 %vm247_vm1, %v2618_v51 }
  0x86   : > { %2115 = vmatmul.mubr.msk.bf16.gmra.mrb[8].mxu1 %vm247_vm1, %v685_v27 }
  0x87   : > { %2197 = vmatmul.mubr.msk.bf16.vlgmr.msra.gmra.mrb[0].mxu0 %vm247_vm1, %v2621_v53  ;;  %2118 = vmatprep.mubr.msk.bf16.mxu1 %vm247_vm1, %v686_v28 }
  0x88   : > { %2200 = vmatprep.mubr.msk.bf16.mxu0 %vm247_vm1, %v2637_v60  ;;  %v2735_v60 = vld [vmem:[%s2786_s2] ss:$0 sm:$0xff] }
  0x8e   : > { %2119 = vmatmul.mubr.msk.bf16.gmra.mrb[12].mxu1 %vm247_vm1, %v687_v33 }
  0x8f   : > { %2201 = vmatmul.mubr.msk.bf16.gmra.mrb[4].mxu0 %vm247_vm1, %v2639_v63  ;;  %2132 = vmatprep.mubr.msk.bf16.mxu1 %vm247_vm1, %v851_v34 }
  0x90   : > { %2204 = vmatprep.mubr.msk.bf16.mxu0 %vm247_vm1, %v2652_v5 }
  0x96   : > { %2133 = vmatmul.mubr.msk.bf16.vlgmr.msra.gmra.mrb[8].mxu1 %vm247_vm1, %v852_v41 }
  0x97   : > { %2205 = vmatmul.mubr.msk.bf16.gmra.mrb[8].mxu0 %vm247_vm1, %v2654_v6  ;;  %2136 = vmatprep.mubr.msk.bf16.mxu1 %vm247_vm1, %v853_v42 }
  0x98   : > { %2208 = vmatprep.mubr.msk.bf16.mxu0 %vm247_vm1, %v520_v11 }
  0x9e   : > { %2137 = vmatmul.mubr.msk.bf16.gmra.mrb[12].mxu1 %vm247_vm1, %v854_v47 }
  0x9f   : > { %2209 = vmatmul.mubr.msk.bf16.gmra.mrb[12].mxu0 %vm247_vm1, %v1518_v49 }
 0x149   : > { %v2108_v51 = vpop.f32.mrb[0].mxu1 }
 0x14a   : > { %v751_v52 = vpop.f32.mrb[1].mxu1 }
 0x14b   : > { %v2109_v53 = vpop.f32.mrb[2].mxu1 }
 0x14c   : > { %v754_v54 = vpop.f32.mrb[3].mxu1 }
 0x151   : > { %v2112_v55 = vpop.f32.mrb[4].mxu1 }
 0x152   : > { %v767_v56 = vpop.f32.mrb[5].mxu1 }
 0x153   : > { %v2113_v57 = vpop.f32.mrb[6].mxu1 }
 0x154   : > { %v770_v58 = vpop.f32.mrb[7].mxu1 }
 0x15a   : > { %v2198_v59 = vpop.f32.mrb[0].mxu0 }
 0x15b   : > { %v2214_v61 = vadd.f32 %v2198_v59, %v2108_v51  ;;  %v1582_v63 = vpop.f32.mrb[1].mxu0 }
 0x15c   : > { %v2215_v0 = vadd.f32 %v1582_v63, %v751_v52  ;;  %v2199_v2 = vpop.f32.mrb[2].mxu0 }
 0x15d   : > { %v1670_v1 = vadd.f32 %v2214_v61, %v2735_v60  ;;  %v2216_v4 = vadd.f32 %v2199_v2, %v2109_v53  ;;  %v1585_v5 = vpop.f32.mrb[3].mxu0 }
 0x15e   : > { %v1668_v6 = vadd.f32 %v2215_v0, %v2735_v60  ;;  %v2217_v7 = vadd.f32 %v1585_v5, %v754_v54 }
 0x15f   : > { %v1686_v14 = vmax.f32 %v1670_v1, 0.0  ;;  %v1671_v8 = vadd.f32 %v2216_v4, %v2735_v60 }
 0x160   : > { %v1684_v9 = vmax.f32 %v1668_v6, 0.0  ;;  %v1669_v10 = vadd.f32 %v2217_v7, %v2735_v60 }
 0x161   : > { %1702 = vst [vmem:[%s2742_s20 + $0x10] sm:$0xff] %v1686_v14  ;;  %v1687_v11 = vmax.f32 %v1671_v8, 0.0 }
 0x162   : > { %1700 = vst [vmem:[%s2742_s20] sm:$0xff] %v1684_v9  ;;  %v1685_v12 = vmax.f32 %v1669_v10, 0.0  ;;  %v2202_v24 = vpop.f32.mrb[4].mxu0 }
 0x163   : > { %1703 = vst [vmem:[%s2742_s20 + $0x18] sm:$0xff] %v1687_v11  ;;  %v2218_v13 = vadd.f32 %v2202_v24, %v2112_v55  ;;  %v1598_v36 = vpop.f32.mrb[5].mxu0 }
 0x164   : > { %1701 = vst [vmem:[%s2742_s20 + $0x8] sm:$0xff] %v1685_v12  ;;  %v2219_v15 = vadd.f32 %v1598_v36, %v767_v56  ;;  %v2203_v16 = vpop.f32.mrb[6].mxu0 }
 0x165   : > { %v1674_v17 = vadd.f32 %v2218_v13, %v2735_v60  ;;  %v2220_v38 = vadd.f32 %v2203_v16, %v2113_v57  ;;  %v1601_v18 = vpop.f32.mrb[7].mxu0 }
 0x166   : > { %v1672_v19 = vadd.f32 %v2219_v15, %v2735_v60  ;;  %v2221_v48 = vadd.f32 %v1601_v18, %v770_v58 }
 0x167   : > { %v1690_v20 = vmax.f32 %v1674_v17, 0.0  ;;  %v1675_v21 = vadd.f32 %v2220_v38, %v2735_v60 }
 0x168   : > { %v1688_v22 = vmax.f32 %v1672_v19, 0.0  ;;  %v1673_v3 = vadd.f32 %v2221_v48, %v2735_v60 }
 0x169   : > { %1706 = vst [vmem:[%s2742_s20 + $0x30] sm:$0xff] %v1690_v20  ;;  %v1691_v23 = vmax.f32 %v1675_v21, 0.0  ;;  %v2134_v50 = vpop.f32.mrb[8].mxu1 }
 0x16a   : > { %1704 = vst [vmem:[%s2742_s20 + $0x20] sm:$0xff] %v1688_v22  ;;  %v1689_v25 = vmax.f32 %v1673_v3, 0.0  ;;  %v2206_v62 = vpop.f32.mrb[8].mxu0  ;;  %v950_v26 = vpop.f32.mrb[9].mxu1 }
 0x16b   : > { %1707 = vst [vmem:[%s2742_s20 + $0x38] sm:$0xff] %v1691_v23  ;;  %v2222_v27 = vadd.f32 %v2206_v62, %v2134_v50  ;;  %v1614_v28 = vpop.f32.mrb[9].mxu0  ;;  %v2135_v29 = vpop.f32.mrb[10].mxu1 }
 0x16c   : > { %1705 = vst [vmem:[%s2742_s20 + $0x28] sm:$0xff] %v1689_v25  ;;  %v2223_v30 = vadd.f32 %v1614_v28, %v950_v26  ;;  %v2207_v31 = vpop.f32.mrb[10].mxu0  ;;  %v953_v32 = vpop.f32.mrb[11].mxu1 }
 0x16d   : > { %v1678_v33 = vadd.f32 %v2222_v27, %v2735_v60  ;;  %v2224_v34 = vadd.f32 %v2207_v31, %v2135_v29  ;;  %v1617_v35 = vpop.f32.mrb[11].mxu0 }
 0x16e   : > { %v1676_v37 = vadd.f32 %v2223_v30, %v2735_v60  ;;  %v2225_v39 = vadd.f32 %v1617_v35, %v953_v32 }
 0x16f   : > { %v1694_v40 = vmax.f32 %v1678_v33, 0.0  ;;  %v1679_v41 = vadd.f32 %v2224_v34, %v2735_v60 }
 0x170   : > { %v1692_v42 = vmax.f32 %v1676_v37, 0.0  ;;  %v1677_v43 = vadd.f32 %v2225_v39, %v2735_v60 }
 0x171   : > { %1710 = vst [vmem:[%s2742_s20 + $0x50] sm:$0xff] %v1694_v40  ;;  %v1695_v44 = vmax.f32 %v1679_v41, 0.0  ;;  %v2138_v45 = vpop.f32.mrb[12].mxu1 }
 0x172   : > { %1708 = vst [vmem:[%s2742_s20 + $0x40] sm:$0xff] %v1692_v42  ;;  %v1693_v46 = vmax.f32 %v1677_v43, 0.0  ;;  %v2210_v47 = vpop.f32.mrb[12].mxu0  ;;  %v966_v49 = vpop.f32.mrb[13].mxu1 }
 0x173   : > { %1711 = vst [vmem:[%s2742_s20 + $0x58] sm:$0xff] %v1695_v44  ;;  %v2226_v51 = vadd.f32 %v2210_v47, %v2138_v45  ;;  %v1630_v52 = vpop.f32.mrb[13].mxu0  ;;  %v2139_v53 = vpop.f32.mrb[14].mxu1 }
 0x174   : > { %1709 = vst [vmem:[%s2742_s20 + $0x48] sm:$0xff] %v1693_v46  ;;  %v2227_v54 = vadd.f32 %v1630_v52, %v966_v49  ;;  %v2211_v55 = vpop.f32.mrb[14].mxu0  ;;  %v969_v56 = vpop.f32.mrb[15].mxu1 }
 0x175   : > { %v1682_v57 = vadd.f32 %v2226_v51, %v2735_v60  ;;  %v2228_v58 = vadd.f32 %v2211_v55, %v2139_v53  ;;  %v1633_v59 = vpop.f32.mrb[15].mxu0 }
 0x176   : > { %v1680_v61 = vadd.f32 %v2227_v54, %v2735_v60  ;;  %v2229_v63 = vadd.f32 %v1633_v59, %v969_v56 }
 0x177   : > { %v1698_v0 = vmax.f32 %v1682_v57, 0.0  ;;  %v1683_v2 = vadd.f32 %v2228_v58, %v2735_v60 }
 0x178   : > { %v1696_v1 = vmax.f32 %v1680_v61, 0.0  ;;  %v1681_v4 = vadd.f32 %v2229_v63, %v2735_v60 }
 0x179   : > { %1714 = vst [vmem:[%s2742_s20 + $0x70] sm:$0xff] %v1698_v0  ;;  %v1699_v5 = vmax.f32 %v1683_v2, 0.0 }
 0x17a   : > { %1712 = vst [vmem:[%s2742_s20 + $0x60] sm:$0xff] %v1696_v1  ;;  %v1697_v6 = vmax.f32 %v1681_v4, 0.0 }
 0x17b   : > { %1715 = vst [vmem:[%s2742_s20 + $0x78] sm:$0xff] %v1699_v5 }
 0x17c   : > { %1713 = vst [vmem:[%s2742_s20 + $0x68] sm:$0xff] %v1697_v6 }
 0x17d PF: > { %s13_s14 = sadd.s32 1, %s2399_s14   ;;  %s2788_s12 = smov %s2395_s13 }
 0x17e   : > { %p10_p5 = scmp.ge.s32.totalorder %s13_s14, 4   ;;  %s2789_s13 = smov %s2791_s15 }
 0x180   :  { %12 = sbr.rel (!%p10_p5) target bundleno = 2 (0x2), region = 73 }

// kernel: residual_block.3
= control target key start
LH: loop header
LB: loop body
LE: loop exit
PB: predicated region body
PF: predicated region fallthrough
CT: control target
= control target key end

     0   :  { %s2793_s21 = smov 0   ;;  %s2795_s22 = smov 0   ;;  %s3209_s0 = inlined_call_operand.vmem [shape: f32[2,1,176,8], index: 0, kind: input, shape index: {}]   ;;  %s3210_s1 = inlined_call_operand.vmem [shape: bf16[9,8,128], index: 1, kind: input, shape index: {}]   ;;  %s3211_s2 = inlined_call_operand.vmem [shape: f32[1,128], index: 2, kind: input, shape index: {}]   ;;  %s3212_s3 = inlined_call_operand.vmem [shape: bf16[2,128,8], index: 3, kind: input, shape index: {}]   ;;  %s3213_s4 = inlined_call_operand.vmem [shape: bf16[8,128], index: 4, kind: input, shape index: {}]   ;;  %s3214_s5 = inlined_call_operand.vmem [shape: f32[1,128], index: 5, kind: input, shape index: {}]   ;;  %s3215_s6 = inlined_call_operand.vmem [shape: f32[2,128,128], index: 6, kind: output, shape index: {}]  }
   0x1   :  { %s2797_s23 = smov 0  }
   0x2 LB: > { %s28_s24 = sadd.s32 1, %s2752_s22  ;;  %p2153_p0 = scmp.ge.s32.totalorder %s2756_s23, 1  ;;  %s2756_s23 = sphi %s2797_s23, %s16_s23   ;;  %s2752_s22 = sphi %s2795_s22, %s3217_s22   ;;  %s2748_s21 = sphi %s2793_s21, %s3216_s21  }
   0x3   : > { %p30_p1 = scmp.ge.s32.totalorder %s28_s24, 2  ;;  %p243_p2 = scmp.lt.s32.totalorder %s2756_s23, 3 }
   0x5   : > { %s3219_s24 = smov (%p30_p1, %s28_s24), 0  ;;  %p244_p3 = pnand %p2153_p0, %p243_p2 }
   0x6   : > { %v2159_v0 = vld [vmem:[%s3210_s1 + $0x4] sm:$0xf] (!%p244_p3)  ;;  %vm388_vm0 = vcmask (!%p244_p3), 1043456   ;;  %v2203_v1 = vld [vmem:[%s3210_s1 + $0x14] sm:$0xf] (!%p244_p3)  ;;  %p286_p4 = scmp.lt.s32.totalorder (!%p244_p3), %s2748_s21, 1 }
   0x7   : > { %247 = sbr.rel (%p244_p3) target bundleno = 399 (0x18f), region = 44  ;;  %2691 = vmatprep.subr.msk.bf16.mxu1 (!%p244_p3), %vm388_vm0, %v2159_v0  ;;  %v390_v2 = vsel (!%p244_p3), %vm388_vm0, %v2159_v0, 0  ;;  %2696 = vmatprep.subr.msk.bf16.mxu0 (!%p244_p3), %vm388_vm0, %v2203_v1  ;;  %v1162_v3 = vsel (!%p244_p3), %vm388_vm0, %v2203_v1, 0  ;;  %v336_v4 = vld [vmem:[%s3210_s1] sm:$0xf] (!%p244_p3)  ;;  %vm363_vm1 = vcmask (!%p244_p3), 64512  }
   0x8   : > { %2352 = vmatpush3.bf16.msra.mxu1 (!%p244_p3), %v390_v2  ;;  %2442 = vmatpush3.bf16.msra.mxu0 (!%p244_p3), %v1162_v3  ;;  %v2212_v5 = vld [vmem:[%s3210_s1 + $0x18] sm:$0xf] (!%p244_p3)  ;;  %v514_v15 = vsel (!%p244_p3), %vm388_vm0, %v336_v4, 0  ;;  %v2875_v26 = vld [vmem:[%s3210_s1 + $0x8] sm:$0xf] (!%p244_p3) }
   0x9   : > { %2692 = vmatprep.subr.msk.bf16.mxu1 (!%p244_p3), %vm388_vm0, %v336_v4  ;;  %2697 = vmatprep.subr.msk.bf16.mxu0 (!%p244_p3), %vm388_vm0, %v2212_v5  ;;  %v1328_v20 = vsel (!%p244_p3), %vm388_vm0, %v2212_v5, 0  ;;  %v2880_v27 = vld [vmem:[%s3210_s1 + $0x1c] sm:$0xf] (!%p244_p3) }
   0xe   : > { %s3221_s21 = smov (!%p286_p4, %s2748_s21), 1 }
   0xf   : > { %s2701_s9 = smul.u32 176, %s3221_s21  ;;  %s2259_s10 = sshll.u32 %s3221_s21, 6 }
  0x10   : > { %s2836_s13 = scalar_lea.vmem %s3212_s3, %s2259_s10 }
  0x11   : > { %s2841_s16 = scalar_lea.vmem %s3209_s0, %s2701_s9 }
  0x12   : > { %v337_v6 = vld [vmem:[%s2841_s16 + $0x1] sm:$0xff]  ;;  %v338_v7 = vld [vmem:[%s2841_s16 + $0x9] sm:$0xff]  ;;  %v1111_v8 = vld [vmem:[%s2841_s16 + $0x12] sm:$0xff] }
  0x13   : > { %v353_v9 = vpack.c.bf16 %v338_v7, %v337_v6  ;;  %v1112_v10 = vld [vmem:[%s2841_s16 + $0x1a] sm:$0xff]  ;;  %v339_v11 = vld [vmem:[%s2841_s16 + $0x11] sm:$0xff]  ;;  %v1113_v16 = vld [vmem:[%s2841_s16 + $0x22] sm:$0xff] }
  0x14   : > { %v340_v12 = vld [vmem:[%s2841_s16 + $0x19] sm:$0xff]  ;;  %v2849_v13 = vpack.c.bf16 %v1112_v10, %v1111_v8  ;;  %v1114_v17 = vld [vmem:[%s2841_s16 + $0x2a] sm:$0xff]  ;;  %v341_v18 = vld [vmem:[%s2841_s16 + $0x21] sm:$0xff]  ;;  %v664_v8 = vsel %vm388_vm0, %v2875_v26, 0 }
  0x15   : > { %v2851_v14 = vpack.c.bf16 %v340_v12, %v339_v11  ;;  %2353 = vmatprep.mubr.msk.bf16.mxu1 %vm363_vm1, %v353_v9  ;;  %v2858_v19 = vpack.c.bf16 %v1114_v17, %v1113_v16  ;;  %v342_v21 = vld [vmem:[%s2841_s16 + $0x29] sm:$0xff]  ;;  %v1115_v22 = vld [vmem:[%s2841_s16 + $0x32] sm:$0xff]  ;;  %v1116_v23 = vld [vmem:[%s2841_s16 + $0x3a] sm:$0xff]  ;;  %v1494_v9 = vsel %vm388_vm0, %v2880_v27, 0 }
  0x16   : > { %2443 = vmatprep.mubr.msk.bf16.mxu0 %vm363_vm1, %v2849_v13  ;;  %v2868_v24 = vpack.c.bf16 %v342_v21, %v341_v18  ;;  %v2870_v25 = vpack.c.bf16 %v1116_v23, %v1115_v22  ;;  %v343_v28 = vld [vmem:[%s2841_s16 + $0x31] sm:$0xff]  ;;  %v344_v29 = vld [vmem:[%s2841_s16 + $0x39] sm:$0xff]  ;;  %v1117_v30 = vld [vmem:[%s2841_s16 + $0x42] sm:$0xff] }
  0x17   : > { %2354 = vmatmul.mubr.msk.bf16.vlgmr.msra.gmra.mrb[0].mxu1 %vm363_vm1, %v2851_v14  ;;  %2444 = vmatmul.mubr.msk.bf16.vlgmr.msra.gmra.mrb[0].mxu0 %vm363_vm1, %v2858_v19  ;;  %v1118_v31 = vld [vmem:[%s2841_s16 + $0x4a] sm:$0xff]  ;;  %v345_v32 = vld [vmem:[%s2841_s16 + $0x41] sm:$0xff]  ;;  %v1119_v34 = vld [vmem:[%s2841_s16 + $0x52] sm:$0xff]  ;;  %v2898_v36 = vpack.c.bf16 %v344_v29, %v343_v28 }
  0x18   : > { %2370 = vmatpush3.bf16.msra.mxu1 %v514_v15  ;;  %2460 = vmatpush3.bf16.msra.mxu0 %v1328_v20  ;;  %v346_v33 = vld [vmem:[%s2841_s16 + $0x49] sm:$0xff]  ;;  %v1120_v35 = vld [vmem:[%s2841_s16 + $0x5a] sm:$0xff]  ;;  %v2902_v37 = vpack.c.bf16 %v1118_v31, %v1117_v30  ;;  %v347_v40 = vld [vmem:[%s2841_s16 + $0x51] sm:$0xff] }
  0x19   : > { %2357 = vmatprep.mubr.msk.bf16.mxu1 %vm363_vm1, %v2868_v24  ;;  %2447 = vmatprep.mubr.msk.bf16.mxu0 %vm363_vm1, %v2870_v25  ;;  %v2904_v38 = vpack.c.bf16 %v346_v33, %v345_v32  ;;  %v2906_v39 = vpack.c.bf16 %v1120_v35, %v1119_v34  ;;  %v348_v41 = vld [vmem:[%s2841_s16 + $0x59] sm:$0xff]  ;;  %v1121_v42 = vld [vmem:[%s2841_s16 + $0x62] sm:$0xff]  ;;  %v1122_v43 = vld [vmem:[%s2841_s16 + $0x6a] sm:$0xff] }
  0x1a   : > { %2693 = vmatprep.subr.msk.bf16.mxu1 %vm388_vm0, %v2875_v26  ;;  %2698 = vmatprep.subr.msk.bf16.mxu0 %vm388_vm0, %v2880_v27  ;;  %v349_v44 = vld [vmem:[%s2841_s16 + $0x61] sm:$0xff]  ;;  %v350_v45 = vld [vmem:[%s2841_s16 + $0x69] sm:$0xff]  ;;  %v1123_v46 = vld [vmem:[%s2841_s16 + $0x72] sm:$0xff]  ;;  %v2924_v48 = vpack.c.bf16 %v348_v41, %v347_v40  ;;  %v2926_v49 = vpack.c.bf16 %v1122_v43, %v1121_v42 }
  0x1b   : > { %v1124_v47 = vld [vmem:[%s2841_s16 + $0x7a] sm:$0xff]  ;;  %v2928_v50 = vpack.c.bf16 %v350_v45, %v349_v44  ;;  %v351_v52 = vld [vmem:[%s2841_s16 + $0x71] sm:$0xff]  ;;  %v1125_v54 = vld [vmem:[%s2841_s16 + $0x82] sm:$0xff] }
  0x1c   : > { %v2930_v51 = vpack.c.bf16 %v1124_v47, %v1123_v46  ;;  %v352_v53 = vld [vmem:[%s2841_s16 + $0x79] sm:$0xff]  ;;  %v1126_v55 = vld [vmem:[%s2841_s16 + $0x8a] sm:$0xff]  ;;  %v613_v32 = vld [vmem:[%s2841_s16 + $0x2] sm:$0xff] }
  0x1d   : > { %v312_v56 = vld [vmem:[%s2841_s16] sm:$0xff]  ;;  %v313_v57 = vld [vmem:[%s2841_s16 + $0x8] sm:$0xff]  ;;  %v2948_v60 = vpack.c.bf16 %v352_v53, %v351_v52  ;;  %v2950_v61 = vpack.c.bf16 %v1126_v55, %v1125_v54  ;;  %v314_v0 = vld [vmem:[%s2841_s16 + $0x10] sm:$0xff] }
  0x1e   : > { %v1277_v58 = vld [vmem:[%s2841_s16 + $0x20] sm:$0xff]  ;;  %v1278_v59 = vld [vmem:[%s2841_s16 + $0x28] sm:$0xff]  ;;  %v328_v62 = vpack.c.bf16 %v313_v57, %v312_v56  ;;  %v315_v1 = vld [vmem:[%s2841_s16 + $0x18] sm:$0xff] }
  0x1f   : > { %2358 = vmatmul.mubr.msk.bf16.gmra.mrb[4].mxu1 %vm363_vm1, %v2898_v36  ;;  %2448 = vmatmul.mubr.msk.bf16.gmra.mrb[4].mxu0 %vm363_vm1, %v2902_v37  ;;  %v2952_v63 = vpack.c.bf16 %v1278_v59, %v1277_v58  ;;  %v1279_v2 = vld [vmem:[%s2841_s16 + $0x30] sm:$0xff]  ;;  %v1280_v3 = vld [vmem:[%s2841_s16 + $0x38] sm:$0xff]  ;;  %v2965_v4 = vpack.c.bf16 %v315_v1, %v314_v0  ;;  %v1281_v5 = vld [vmem:[%s2841_s16 + $0x40] sm:$0xff] }
  0x20   : > { %2361 = vmatprep.mubr.msk.bf16.mxu1 %vm363_vm1, %v2904_v38  ;;  %2451 = vmatprep.mubr.msk.bf16.mxu0 %vm363_vm1, %v2906_v39  ;;  %v1282_v6 = vld [vmem:[%s2841_s16 + $0x48] sm:$0xff]  ;;  %v2969_v7 = vpack.c.bf16 %v1280_v3, %v1279_v2  ;;  %v2230_v12 = vld [vmem:[%s3210_s1 + $0x20] sm:$0xf]  ;;  %v1283_v15 = vld [vmem:[%s2841_s16 + $0x50] sm:$0xff] }
  0x21   : > { %v2975_v10 = vpack.c.bf16 %v1282_v6, %v1281_v5  ;;  %v2185_v11 = vld [vmem:[%s3210_s1 + $0xc] sm:$0xf]  ;;  %v1284_v16 = vld [vmem:[%s2841_s16 + $0x58] sm:$0xff]  ;;  %v1285_v17 = vld [vmem:[%s2841_s16 + $0x60] sm:$0xff]  ;;  %v1660_v41 = vsel %vm388_vm0, %v2230_v12, 0 }
  0x22   : > { %v1286_v18 = vld [vmem:[%s2841_s16 + $0x68] sm:$0xff]  ;;  %v2997_v20 = vpack.c.bf16 %v1284_v16, %v1283_v15  ;;  %v1287_v22 = vld [vmem:[%s2841_s16 + $0x70] sm:$0xff]  ;;  %v1288_v23 = vld [vmem:[%s2841_s16 + $0x78] sm:$0xff]  ;;  %v830_v40 = vsel %vm388_vm0, %v2185_v11, 0 }
  0x23   : > { %v2999_v21 = vpack.c.bf16 %v1286_v18, %v1285_v17  ;;  %v1289_v26 = vld [vmem:[%s2841_s16 + $0x80] sm:$0xff]  ;;  %v1290_v27 = vld [vmem:[%s2841_s16 + $0x88] sm:$0xff]  ;;  %v1298_v28 = vpack.c.bf16 %v1288_v23, %v1287_v22  ;;  %v1291_v30 = vld [vmem:[%s2841_s16 + $0x90] sm:$0xff] }
  0x24   : > { %v3013_v29 = vpack.c.bf16 %v1290_v27, %v1289_v26  ;;  %v1292_v31 = vld [vmem:[%s2841_s16 + $0x98] sm:$0xff]  ;;  %v614_v33 = vld [vmem:[%s2841_s16 + $0xa] sm:$0xff]  ;;  %v1814_v43 = vld [vmem:[%s3213_s4] sm:$0xf] }
  0x25   : > { %v1300_v34 = vpack.c.bf16 %v1292_v31, %v1291_v30  ;;  %v629_v35 = vpack.c.bf16 %v614_v33, %v613_v32  ;;  %v2194_v42 = vld [vmem:[%s3210_s1 + $0x10] sm:$0xf]  ;;  %v1458_v47 = vld [vmem:[%s2841_s16 + $0x99] sm:$0xff]  ;;  %v1880_v54 = vsel %vm388_vm0, %v1814_v43, 0 }
  0x26   : > { %v1456_v44 = vld [vmem:[%s2841_s16 + $0x89] sm:$0xff]  ;;  %v1457_v46 = vld [vmem:[%s2841_s16 + $0x91] sm:$0xff]  ;;  %v996_v53 = vsel %vm388_vm0, %v2194_v42, 0  ;;  %v2730_v56 = vld [vmem:[%s2836_s13 + $0x20] sm:$0xff]  }
  0x27   : > { %2362 = vmatmul.mubr.msk.bf16.gmra.mrb[8].mxu1 %vm363_vm1, %v2924_v48  ;;  %2452 = vmatmul.mubr.msk.bf16.gmra.mrb[8].mxu0 %vm363_vm1, %v2926_v49  ;;  %v1466_v52 = vpack.c.bf16 %v1458_v47, %v1457_v46  ;;  %v2729_v55 = vld [vmem:[%s2836_s13 + $0x18] sm:$0xff]   ;;  %v3145_v59 = vld [vmem:[%s3214_s5] ss:$0 sm:$0xff] }
  0x28   : > { %2365 = vmatprep.mubr.msk.bf16.mxu1 %vm363_vm1, %v2928_v50  ;;  %2455 = vmatprep.mubr.msk.bf16.mxu0 %vm363_vm1, %v2930_v51 }
  0x2f   : > { %2366 = vmatmul.mubr.msk.bf16.gmra.mrb[12].mxu1 %vm363_vm1, %v2948_v60  ;;  %2456 = vmatmul.mubr.msk.bf16.gmra.mrb[12].mxu0 %vm363_vm1, %v2950_v61 }
  0x30   : > { %2371 = vmatprep.mubr.msk.bf16.mxu1 %vm363_vm1, %v328_v62  ;;  %2461 = vmatprep.mubr.msk.bf16.mxu0 %vm363_vm1, %v2952_v63 }
  0x37   : > { %2372 = vmatmul.mubr.msk.bf16.vlgmr.msra.gmra.mrb[0].mxu1 %vm363_vm1, %v2965_v4  ;;  %2462 = vmatmul.mubr.msk.bf16.vlgmr.msra.gmra.mrb[0].mxu0 %vm363_vm1, %v2969_v7 }
  0x38   : > { %2388 = vmatpush3.bf16.msra.mxu1 %v664_v8  ;;  %2478 = vmatpush3.bf16.msra.mxu0 %v1494_v9 }
  0x39   : > { %2375 = vmatprep.mubr.msk.bf16.mxu1 %vm363_vm1, %v2952_v63  ;;  %2465 = vmatprep.mubr.msk.bf16.mxu0 %vm363_vm1, %v2975_v10 }
  0x3a   : > { %2694 = vmatprep.subr.msk.bf16.mxu1 %vm388_vm0, %v2185_v11  ;;  %2699 = vmatprep.subr.msk.bf16.mxu0 %vm388_vm0, %v2230_v12 }
  0x3f   : > { %2376 = vmatmul.mubr.msk.bf16.gmra.mrb[4].mxu1 %vm363_vm1, %v2969_v7  ;;  %2466 = vmatmul.mubr.msk.bf16.gmra.mrb[4].mxu0 %vm363_vm1, %v2997_v20 }
  0x40   : > { %2379 = vmatprep.mubr.msk.bf16.mxu1 %vm363_vm1, %v2975_v10  ;;  %2469 = vmatprep.mubr.msk.bf16.mxu0 %vm363_vm1, %v2999_v21 }
  0x47   : > { %2380 = vmatmul.mubr.msk.bf16.gmra.mrb[8].mxu1 %vm363_vm1, %v2997_v20  ;;  %2470 = vmatmul.mubr.msk.bf16.gmra.mrb[8].mxu0 %vm363_vm1, %v1298_v28 }
  0x48   : > { %2383 = vmatprep.mubr.msk.bf16.mxu1 %vm363_vm1, %v2999_v21  ;;  %2473 = vmatprep.mubr.msk.bf16.mxu0 %vm363_vm1, %v3013_v29 }
  0x4f   : > { %2384 = vmatmul.mubr.msk.bf16.gmra.mrb[12].mxu1 %vm363_vm1, %v1298_v28  ;;  %2474 = vmatmul.mubr.msk.bf16.gmra.mrb[12].mxu0 %vm363_vm1, %v1300_v34 }
  0x50   : > { %2389 = vmatprep.mubr.msk.bf16.mxu1 %vm363_vm1, %v629_v35  ;;  %2479 = vmatprep.mubr.msk.bf16.mxu0 %vm363_vm1, %v2868_v24 }
  0x57   : > { %2390 = vmatmul.mubr.msk.bf16.vlgmr.msra.gmra.mrb[0].mxu1 %vm363_vm1, %v2849_v13  ;;  %2480 = vmatmul.mubr.msk.bf16.vlgmr.msra.gmra.mrb[0].mxu0 %vm363_vm1, %v2898_v36  ;;  %v1455_v13 = vld [vmem:[%s2841_s16 + $0x81] sm:$0xff] }
  0x58   : > { %2406 = vmatpush3.bf16.msra.mxu1 %v830_v40  ;;  %2496 = vmatpush3.bf16.msra.mxu0 %v1660_v41  ;;  %v1465_v45 = vpack.c.bf16 %v1456_v44, %v1455_v13 }
  0x59   : > { %2393 = vmatprep.mubr.msk.bf16.mxu1 %vm363_vm1, %v2858_v19  ;;  %2483 = vmatprep.mubr.msk.bf16.mxu0 %vm363_vm1, %v2904_v38 }
  0x5a   : > { %2695 = vmatprep.subr.msk.bf16.mxu1 %vm388_vm0, %v2194_v42  ;;  %2700 = vmatprep.subr.msk.bf16.mxu0 %vm388_vm0, %v1814_v43 }
  0x5f   : > { %2394 = vmatmul.mubr.msk.bf16.gmra.mrb[4].mxu1 %vm363_vm1, %v2870_v25  ;;  %2484 = vmatmul.mubr.msk.bf16.gmra.mrb[4].mxu0 %vm363_vm1, %v2924_v48 }
  0x60   : > { %2397 = vmatprep.mubr.msk.bf16.mxu1 %vm363_vm1, %v2902_v37  ;;  %2487 = vmatprep.mubr.msk.bf16.mxu0 %vm363_vm1, %v2928_v50 }
  0x67   : > { %2398 = vmatmul.mubr.msk.bf16.gmra.mrb[8].mxu1 %vm363_vm1, %v2906_v39  ;;  %2488 = vmatmul.mubr.msk.bf16.gmra.mrb[8].mxu0 %vm363_vm1, %v2948_v60 }
  0x68   : > { %2401 = vmatprep.mubr.msk.bf16.mxu1 %vm363_vm1, %v2926_v49  ;;  %2491 = vmatprep.mubr.msk.bf16.mxu0 %vm363_vm1, %v1465_v45 }
  0x6f   : > { %2402 = vmatmul.mubr.msk.bf16.gmra.mrb[12].mxu1 %vm363_vm1, %v2930_v51  ;;  %2492 = vmatmul.mubr.msk.bf16.gmra.mrb[12].mxu0 %vm363_vm1, %v1466_v52 }
  0x70   : > { %2407 = vmatprep.mubr.msk.bf16.mxu1 %vm363_vm1, %v2965_v4  ;;  %2497 = vmatprep.mubr.msk.bf16.mxu0 %vm363_vm1, %v2858_v19  ;;  %v1623_v19 = vld [vmem:[%s2841_s16 + $0x92] sm:$0xff] }
  0x77   : > { %2408 = vmatmul.mubr.msk.bf16.vlgmr.msra.gmra.mrb[0].mxu1 %vm363_vm1, %v2952_v63  ;;  %2498 = vmatmul.mubr.msk.bf16.vlgmr.msra.gmra.mrb[0].mxu0 %vm363_vm1, %v2870_v25  ;;  %v1624_v25 = vld [vmem:[%s2841_s16 + $0x9a] sm:$0xff] }
  0x78   : > { %2424 = vmatpush3.bf16.msra.mxu1 %v996_v53  ;;  %2514 = vmatpush3.bf16.msra.mxu0 %v1880_v54 }
  0x79   : > { %2411 = vmatprep.mubr.msk.bf16.mxu1 %vm363_vm1, %v2969_v7  ;;  %2501 = vmatprep.mubr.msk.bf16.mxu0 %vm363_vm1, %v2902_v37  ;;  %v1632_v37 = vpack.c.bf16 %v1624_v25, %v1623_v19 }
  0x7f   : > { %2412 = vmatmul.mubr.msk.bf16.gmra.mrb[4].mxu1 %vm363_vm1, %v2975_v10  ;;  %2502 = vmatmul.mubr.msk.bf16.gmra.mrb[4].mxu0 %vm363_vm1, %v2906_v39  ;;  %v2726_v39 = vld [vmem:[%s2836_s13] sm:$0xff]  }
  0x80   : > { %2415 = vmatprep.mubr.msk.bf16.mxu1 %vm363_vm1, %v2997_v20  ;;  %2505 = vmatprep.mubr.msk.bf16.mxu0 %vm363_vm1, %v2926_v49  ;;  %v2727_v49 = vld [vmem:[%s2836_s13 + $0x8] sm:$0xff]  }
  0x87   : > { %2416 = vmatmul.mubr.msk.bf16.gmra.mrb[8].mxu1 %vm363_vm1, %v2999_v21  ;;  %2506 = vmatmul.mubr.msk.bf16.gmra.mrb[8].mxu0 %vm363_vm1, %v2930_v51  ;;  %v2728_v51 = vld [vmem:[%s2836_s13 + $0x10] sm:$0xff]  }
  0x88   : > { %2419 = vmatprep.mubr.msk.bf16.mxu1 %vm363_vm1, %v1298_v28  ;;  %2509 = vmatprep.mubr.msk.bf16.mxu0 %vm363_vm1, %v2950_v61 }
  0x8f   : > { %2420 = vmatmul.mubr.msk.bf16.gmra.mrb[12].mxu1 %vm363_vm1, %v3013_v29  ;;  %2510 = vmatmul.mubr.msk.bf16.gmra.mrb[12].mxu0 %vm363_vm1, %v1632_v37 }
  0x90   : > { %2425 = vmatprep.mubr.msk.bf16.mxu1 %vm363_vm1, %v2851_v14  ;;  %2515 = vmatprep.mubr.msk.bf16.mxu0 %vm363_vm1, %v2726_v39  ;;  %v2731_v14 = vld [vmem:[%s2836_s13 + $0x28] sm:$0xff]  }
  0x97   : > { %2426 = vmatmul.mubr.msk.bf16.vlgmr.msra.gmra.mrb[0].mxu1 %vm363_vm1, %v2868_v24  ;;  %2516 = vmatmul.mubr.msk.bf16.vlgmr.msra.gmra.mrb[0].mxu0 %vm363_vm1, %v2727_v49  ;;  %v2732_v24 = vld [vmem:[%s2836_s13 + $0x30] sm:$0xff]  }
  0x98   : > { %2429 = vmatprep.mubr.msk.bf16.mxu1 %vm363_vm1, %v2898_v36  ;;  %2519 = vmatprep.mubr.msk.bf16.mxu0 %vm363_vm1, %v2728_v51  ;;  %v2733_v36 = vld [vmem:[%s2836_s13 + $0x38] sm:$0xff]   ;;  %s2260_s13 = sshll.u32 %s3221_s21, 7 }
  0x99   : > { %s3155_s16 = scalar_lea.vmem %s3215_s6, %s2260_s13 }
  0x9f   : > { %2430 = vmatmul.mubr.msk.bf16.gmra.mrb[4].mxu1 %vm363_vm1, %v2904_v38  ;;  %2520 = vmatmul.mubr.msk.bf16.gmra.mrb[4].mxu0 %vm363_vm1, %v2729_v55  ;;  %v3139_v38 = vld [vmem:[%s3211_s2] ss:$0 sm:$0xff] }
  0xa0   : > { %2433 = vmatprep.mubr.msk.bf16.mxu1 %vm363_vm1, %v2924_v48  ;;  %2523 = vmatprep.mubr.msk.bf16.mxu0 %vm363_vm1, %v2730_v56 }
  0xa7   : > { %2434 = vmatmul.mubr.msk.bf16.gmra.mrb[8].mxu1 %vm363_vm1, %v2928_v50  ;;  %2524 = vmatmul.mubr.msk.bf16.gmra.mrb[8].mxu0 %vm363_vm1, %v2731_v14 }
  0xa8   : > { %2437 = vmatprep.mubr.msk.bf16.mxu1 %vm363_vm1, %v2948_v60  ;;  %2527 = vmatprep.mubr.msk.bf16.mxu0 %vm363_vm1, %v2732_v24 }
  0xaf   : > { %2438 = vmatmul.mubr.msk.bf16.gmra.mrb[12].mxu1 %vm363_vm1, %v1465_v45  ;;  %2528 = vmatmul.mubr.msk.bf16.gmra.mrb[12].mxu0 %vm363_vm1, %v2733_v36 }
 0x16a   : > { %v2427_v48 = vpop.f32.mrb[0].mxu1  ;;  %v2517_v57 = vpop.f32.mrb[0].mxu0 }
 0x16b   : > { %v2531_v50 = vadd.f32 %v2427_v48, %v3139_v38  ;;  %v1032_v58 = vpop.f32.mrb[1].mxu1  ;;  %v1916_v61 = vpop.f32.mrb[1].mxu0 }
 0x16c   : > { %v2533_v60 = vadd.f32 %v3139_v38, %v1032_v58  ;;  %v2428_v62 = vpop.f32.mrb[2].mxu1  ;;  %v2518_v1 = vpop.f32.mrb[2].mxu0 }
 0x16d   : > { %v2532_v63 = vadd.f32 %v2531_v50, %v2517_v57  ;;  %v2535_v0 = vadd.f32 %v2428_v62, %v3139_v38  ;;  %v1035_v2 = vpop.f32.mrb[3].mxu1  ;;  %v1919_v5 = vpop.f32.mrb[3].mxu0 }
 0x16e   : > { %v2534_v3 = vadd.f32 %v2533_v60, %v1916_v61  ;;  %v2537_v4 = vadd.f32 %v3139_v38, %v1035_v2 }
 0x16f   : > { %v2004_v6 = vadd.f32 %v2532_v63, %v3145_v59  ;;  %v2536_v7 = vadd.f32 %v2535_v0, %v2518_v1 }
 0x170   : > { %v2002_v8 = vadd.f32 %v2534_v3, %v3145_v59  ;;  %v2538_v9 = vadd.f32 %v2537_v4, %v1919_v5 }
 0x171   : > { %v2020_v10 = vmax.f32 %v2004_v6, 0.0  ;;  %v2005_v11 = vadd.f32 %v2536_v7, %v3145_v59 }
 0x172   : > { %v2018_v12 = vmax.f32 %v2002_v8, 0.0  ;;  %v2003_v15 = vadd.f32 %v2538_v9, %v3145_v59  ;;  %v2431_v16 = vpop.f32.mrb[4].mxu1  ;;  %v2521_v20 = vpop.f32.mrb[4].mxu0 }
 0x173   : > { %2036 = vst [vmem:[%s3155_s16 + $0x10] sm:$0xff] %v2020_v10  ;;  %v2021_v17 = vmax.f32 %v2005_v11, 0.0  ;;  %v2539_v18 = vadd.f32 %v2431_v16, %v3139_v38  ;;  %v1048_v21 = vpop.f32.mrb[5].mxu1  ;;  %v1932_v26 = vpop.f32.mrb[5].mxu0 }
 0x174   : > { %2034 = vst [vmem:[%s3155_s16] sm:$0xff] %v2018_v12  ;;  %v2019_v22 = vmax.f32 %v2003_v15, 0.0  ;;  %v2541_v23 = vadd.f32 %v3139_v38, %v1048_v21  ;;  %v2432_v27 = vpop.f32.mrb[6].mxu1  ;;  %v2522_v30 = vpop.f32.mrb[6].mxu0 }
 0x175   : > { %2037 = vst [vmem:[%s3155_s16 + $0x18] sm:$0xff] %v2021_v17  ;;  %v2540_v28 = vadd.f32 %v2539_v18, %v2521_v20  ;;  %v2543_v29 = vadd.f32 %v2432_v27, %v3139_v38  ;;  %v1051_v31 = vpop.f32.mrb[7].mxu1  ;;  %v1935_v34 = vpop.f32.mrb[7].mxu0 }
 0x176   : > { %2035 = vst [vmem:[%s3155_s16 + $0x8] sm:$0xff] %v2019_v22  ;;  %v2542_v32 = vadd.f32 %v2541_v23, %v1932_v26  ;;  %v2545_v33 = vadd.f32 %v3139_v38, %v1051_v31 }
 0x177   : > { %v2008_v35 = vadd.f32 %v2540_v28, %v3145_v59  ;;  %v2544_v40 = vadd.f32 %v2543_v29, %v2522_v30 }
 0x178   : > { %v2006_v41 = vadd.f32 %v2542_v32, %v3145_v59  ;;  %v2546_v42 = vadd.f32 %v2545_v33, %v1935_v34 }
 0x179   : > { %v2024_v43 = vmax.f32 %v2008_v35, 0.0  ;;  %v2009_v13 = vadd.f32 %v2544_v40, %v3145_v59 }
 0x17a   : > { %v2022_v44 = vmax.f32 %v2006_v41, 0.0  ;;  %v2007_v45 = vadd.f32 %v2546_v42, %v3145_v59  ;;  %v2435_v46 = vpop.f32.mrb[8].mxu1  ;;  %v2525_v53 = vpop.f32.mrb[8].mxu0 }
 0x17b   : > { %2040 = vst [vmem:[%s3155_s16 + $0x30] sm:$0xff] %v2024_v43  ;;  %v2025_v47 = vmax.f32 %v2009_v13, 0.0  ;;  %v2547_v52 = vadd.f32 %v2435_v46, %v3139_v38  ;;  %v1064_v54 = vpop.f32.mrb[9].mxu1  ;;  %v1948_v37 = vpop.f32.mrb[9].mxu0 }
 0x17c   : > { %2038 = vst [vmem:[%s3155_s16 + $0x20] sm:$0xff] %v2022_v44  ;;  %v2023_v19 = vmax.f32 %v2007_v45, 0.0  ;;  %v2549_v25 = vadd.f32 %v3139_v38, %v1064_v54  ;;  %v2436_v39 = vpop.f32.mrb[10].mxu1  ;;  %v2526_v55 = vpop.f32.mrb[10].mxu0 }
 0x17d   : > { %2041 = vst [vmem:[%s3155_s16 + $0x38] sm:$0xff] %v2025_v47  ;;  %v2548_v49 = vadd.f32 %v2547_v52, %v2525_v53  ;;  %v2551_v51 = vadd.f32 %v2436_v39, %v3139_v38  ;;  %v1067_v56 = vpop.f32.mrb[11].mxu1  ;;  %v1951_v36 = vpop.f32.mrb[11].mxu0 }
 0x17e   : > { %2039 = vst [vmem:[%s3155_s16 + $0x28] sm:$0xff] %v2023_v19  ;;  %v2550_v14 = vadd.f32 %v2549_v25, %v1948_v37  ;;  %v2553_v24 = vadd.f32 %v3139_v38, %v1067_v56 }
 0x17f   : > { %v2012_v48 = vadd.f32 %v2548_v49, %v3145_v59  ;;  %v2552_v50 = vadd.f32 %v2551_v51, %v2526_v55 }
 0x180   : > { %v2010_v57 = vadd.f32 %v2550_v14, %v3145_v59  ;;  %v2554_v58 = vadd.f32 %v2553_v24, %v1951_v36 }
 0x181   : > { %v2028_v60 = vmax.f32 %v2012_v48, 0.0  ;;  %v2013_v61 = vadd.f32 %v2552_v50, %v3145_v59 }
 0x182   : > { %v2026_v62 = vmax.f32 %v2010_v57, 0.0  ;;  %v2011_v63 = vadd.f32 %v2554_v58, %v3145_v59  ;;  %v2439_v0 = vpop.f32.mrb[12].mxu1  ;;  %v2529_v3 = vpop.f32.mrb[12].mxu0 }
 0x183   : > { %2044 = vst [vmem:[%s3155_s16 + $0x50] sm:$0xff] %v2028_v60  ;;  %v2029_v1 = vmax.f32 %v2013_v61, 0.0  ;;  %v2555_v2 = vadd.f32 %v2439_v0, %v3139_v38  ;;  %v1080_v4 = vpop.f32.mrb[13].mxu1  ;;  %v1964_v7 = vpop.f32.mrb[13].mxu0 }
 0x184   : > { %2042 = vst [vmem:[%s3155_s16 + $0x40] sm:$0xff] %v2026_v62  ;;  %v2027_v5 = vmax.f32 %v2011_v63, 0.0  ;;  %v2557_v6 = vadd.f32 %v3139_v38, %v1080_v4  ;;  %v2440_v8 = vpop.f32.mrb[14].mxu1  ;;  %v2530_v11 = vpop.f32.mrb[14].mxu0 }
 0x185   : > { %2045 = vst [vmem:[%s3155_s16 + $0x58] sm:$0xff] %v2029_v1  ;;  %v2556_v9 = vadd.f32 %v2555_v2, %v2529_v3  ;;  %v2559_v10 = vadd.f32 %v2440_v8, %v3139_v38  ;;  %v1083_v12 = vpop.f32.mrb[15].mxu1  ;;  %v1967_v17 = vpop.f32.mrb[15].mxu0 }
 0x186   : > { %2043 = vst [vmem:[%s3155_s16 + $0x48] sm:$0xff] %v2027_v5  ;;  %v2558_v15 = vadd.f32 %v2557_v6, %v1964_v7  ;;  %v2561_v16 = vadd.f32 %v3139_v38, %v1083_v12 }
 0x187   : > { %v2016_v18 = vadd.f32 %v2556_v9, %v3145_v59  ;;  %v2560_v20 = vadd.f32 %v2559_v10, %v2530_v11 }
 0x188   : > { %v2014_v21 = vadd.f32 %v2558_v15, %v3145_v59  ;;  %v2562_v22 = vadd.f32 %v2561_v16, %v1967_v17 }
 0x189   : > { %v2032_v23 = vmax.f32 %v2016_v18, 0.0  ;;  %v2017_v26 = vadd.f32 %v2560_v20, %v3145_v59 }
 0x18a   : > { %v2030_v27 = vmax.f32 %v2014_v21, 0.0  ;;  %v2015_v28 = vadd.f32 %v2562_v22, %v3145_v59 }
 0x18b   : > { %2048 = vst [vmem:[%s3155_s16 + $0x70] sm:$0xff] %v2032_v23  ;;  %v2033_v29 = vmax.f32 %v2017_v26, 0.0 }
 0x18c   : > { %2046 = vst [vmem:[%s3155_s16 + $0x60] sm:$0xff] %v2030_v27  ;;  %v2031_v30 = vmax.f32 %v2015_v28, 0.0 }
 0x18d   : > { %2049 = vst [vmem:[%s3155_s16 + $0x78] sm:$0xff] %v2033_v29 }
 0x18e   : > { %2047 = vst [vmem:[%s3155_s16 + $0x68] sm:$0xff] %v2031_v30 }
 0x18f PF: > { %s16_s23 = sadd.s32 1, %s2756_s23   ;;  %s3216_s21 = smov %s2752_s22 }
 0x190   : > { %p13_p5 = scmp.ge.s32.totalorder %s16_s23, 4   ;;  %s3217_s22 = smov %s3219_s24 }
 0x192   :  { %15 = sbr.rel (!%p13_p5) target bundleno = 2 (0x2), region = 85 }

</bundles_post_ra>
